<compile_context>
chip_gen: v5e
topology: v5e:2x2
jax: 0.10.0
libtpu: 0.0.40
codegen_flags: <defaults>
</compile_context>

<pallas_src>
import functools

import numpy as np
import jax
import jax.numpy as jnp
from jax.experimental import pallas as pl
from jax.experimental.pallas import tpu as pltpu


# ----------------------------------------------------------------------------
# In-kernel helpers
# ----------------------------------------------------------------------------
def _conv_dilated(pad_ref, y, w_ref, b, *, K, d, pad):
    """Dilated Conv1d with symmetric zero padding, BN/bias already folded.

    y:      [L, Cin]        f32 value (current activation)
    w_ref:  [K, Cin, Cout]  bf16 ref  (BN-folded weights)
    b:      [1, Cout]       f32 value (BN-folded bias)
    returns [L_out, Cout]   f32,  L_out = L + 2*pad - d*(K-1)
    """
    L, C = y.shape
    Lp = L + 2 * pad
    L_out = Lp - d * (K - 1)
    Cout = w_ref.shape[-1]

    # Zero-pad along length via the shared VMEM scratch (masked slice stores).
    pad_ref[...] = jnp.zeros_like(pad_ref)
    pad_ref[pl.ds(pad, L), pl.ds(0, C)] = y
    yp = pad_ref[pl.ds(0, Lp), pl.ds(0, C)]                      # [Lp, C] f32

    acc = jnp.zeros((L_out, Cout), jnp.float32)
    for k in range(K):                      # static unroll over kernel taps
        xs = yp[k * d:k * d + L_out, :].astype(jnp.bfloat16)     # [L_out, C]
        acc = acc + jax.lax.dot_general(
            xs, w_ref[k],                                        # [C, Cout] bf16
            dimension_numbers=(((1,), (0,)), ((), ())),
            preferred_element_type=jnp.float32)
    return acc + b


def _tcn_kernel(*refs, cfg):
    # refs = (x_ref, *param_refs, o_ref, pad_scratch)
    x_ref = refs[0]
    o_ref = refs[-2]
    pad_ref = refs[-1]
    it = iter(refs[1:-2])

    y = x_ref[0].astype(jnp.float32)                             # [T, C0]

    for blk in cfg["blocks"]:
        K, d, pad = blk["K"], blk["d"], blk["pad"]
        w1 = next(it); b1 = next(it)[...]
        w2 = next(it); b2 = next(it)[...]
        if blk["has_down"]:
            wd = next(it)[...]; bd = next(it)[...]
        P = next(it)[...]                                        # [L2, L_in] one-hot

        # conv1 -> (folded BN) -> ReLU.
        # TODO(synk): Dropout treated as eval-mode identity (no RNG mask).
        h = jnp.maximum(_conv_dilated(pad_ref, y, w1, b1, K=K, d=d, pad=pad), 0.0)

        # Residual path: optional 1x1 downsample, then nearest-interp as a
        # one-hot selection matmul (exact, f32).
        if blk["has_down"]:
            res = jax.lax.dot_general(
                y.astype(jnp.bfloat16), wd,
                dimension_numbers=(((1,), (0,)), ((), ())),
                preferred_element_type=jnp.float32) + bd
        else:
            res = y
        res_i = jax.lax.dot_general(
            P, res, dimension_numbers=(((1,), (0,)), ((), ())),
            preferred_element_type=jnp.float32)                  # [L2, Cout]

        # conv2 -> (folded BN) -> ReLU, + residual, ReLU.
        out = jnp.maximum(_conv_dilated(pad_ref, h, w2, b2, K=K, d=d, pad=pad), 0.0)
        y = jnp.maximum(out + res_i, 0.0)

    # conv_decoder: Conv1d(k=3, pad=1) -> ReLU -> Conv1d(k=1), then mean over
    # time.  The 1x1 conv is linear with nothing after it, so
    # mean_t(conv1x1(h)) == conv1x1(mean_t(h)) exactly.
    dw1 = next(it); db1 = next(it)[...]
    dw2 = next(it)[...]; db2 = next(it)[...]
    K_dec = dw1.shape[0]
    h = jnp.maximum(_conv_dilated(pad_ref, y, dw1, db1, K=K_dec, d=1, pad=1), 0.0)
    L = h.shape[0]
    m = jax.lax.dot_general(                                     # mean over time
        jnp.full((1, L), 1.0 / L, jnp.float32), h,
        dimension_numbers=(((1,), (0,)), ((), ())),
        preferred_element_type=jnp.float32)                      # [1, 64]
    out = jax.lax.dot_general(
        m.astype(jnp.bfloat16), dw2,
        dimension_numbers=(((1,), (0,)), ((), ())),
        preferred_element_type=jnp.float32) + db2                # [1, 4096]
    o_ref[0] = out                                               # lane-dense store


# ----------------------------------------------------------------------------
# Wrapper: fold params, build constant inputs, one pallas_call
# ----------------------------------------------------------------------------
def _nearest_onehot(l_in, l_out):
    # F.interpolate(mode='nearest'): src = floor(dst * in/out), clamped.
    idx = np.minimum(np.floor(np.arange(l_out) * (l_in / l_out)).astype(np.int64),
                     l_in - 1)
    return (idx[:, None] == np.arange(l_in)[None, :]).astype(np.float32)


def tcn_forward(params, x, kernel_size):
    # x: [B, T, C, H, W].  PyTorch: mean over (H,W) then permute to NCL.
    # Our in-kernel layout is (length, channels) so [B, T, C] is already right.
    x = jnp.mean(x, axis=(-2, -1)).astype(jnp.float32)           # [B, T, C0]
    B, T, C0 = x.shape
    eps = 1e-5

    flat = [x]
    specs = [pl.BlockSpec((1, T, C0), lambda b: (b, 0, 0))]

    def add_const(arr):
        arr = jnp.asarray(arr)
        nd = arr.ndim
        flat.append(arr)
        specs.append(pl.BlockSpec(arr.shape, lambda b, nd=nd: (0,) * nd))

    cfg_blocks = []
    L, Cin = T, C0
    max_lp, max_c = 1, 1

    for i, blk in enumerate(params["blocks"]):
        d = 2 ** i
        pad = (kernel_size - 1) * d
        Cout = blk["w1"].shape[-1]
        # Fold conv bias + inference-mode BatchNorm into weights/bias.
        s1 = blk["bn1_gamma"] / jnp.sqrt(blk["bn1_var"] + eps)
        sh1 = blk["bn1_beta"] - blk["bn1_mean"] * s1
        s2 = blk["bn2_gamma"] / jnp.sqrt(blk["bn2_var"] + eps)
        sh2 = blk["bn2_beta"] - blk["bn2_mean"] * s2
        add_const((blk["w1"] * s1[None, None, :]).astype(jnp.bfloat16))
        add_const((blk["b1"] * s1 + sh1).reshape(1, Cout).astype(jnp.float32))
        add_const((blk["w2"] * s2[None, None, :]).astype(jnp.bfloat16))
        add_const((blk["b2"] * s2 + sh2).reshape(1, Cout).astype(jnp.float32))
        has_down = "wd" in blk
        if has_down:
            add_const(blk["wd"][0].astype(jnp.bfloat16))          # [Cin, Cout]
            add_const(blk["bd"].reshape(1, Cout).astype(jnp.float32))
        L1 = L + pad                                              # after conv1
        L2 = L1 + pad                                             # after conv2
        add_const(_nearest_onehot(L, L2))                         # [L2, L]
        max_lp = max(max_lp, L + 2 * pad, L1 + 2 * pad)
        max_c = max(max_c, Cin, Cout)
        cfg_blocks.append(dict(K=kernel_size, d=d, pad=pad, has_down=has_down))
        L, Cin = L2, Cout

    # Decoder weights (no BN); the 1x1 conv is fused with the time-mean.
    C_dec = params["dec_w1"].shape[-1]
    Nout = params["dec_w2"].shape[-1]
    add_const(params["dec_w1"].astype(jnp.bfloat16))              # [3, Clast, 64]
    add_const(params["dec_b1"].reshape(1, C_dec).astype(jnp.float32))
    add_const(params["dec_w2"][0].astype(jnp.bfloat16))           # [64, 4096]
    add_const(params["dec_b2"].reshape(1, Nout).astype(jnp.float32))
    max_lp = max(max_lp, L + 2)
    max_c = max(max_c, Cin)

    pad_rows = ((max_lp + 7) // 8) * 8
    pad_cols = ((max_c + 127) // 128) * 128

    kernel = functools.partial(_tcn_kernel, cfg=dict(blocks=cfg_blocks))
    out = pl.pallas_call(
        kernel,
        out_shape=jax.ShapeDtypeStruct((B, 1, Nout), jnp.float32),
        grid=(B,),
        in_specs=specs,
        out_specs=pl.BlockSpec((1, 1, Nout), lambda b: (b, 0, 0)),
        scratch_shapes=[pltpu.VMEM((pad_rows, pad_cols), jnp.float32)],
        compiler_params=pltpu.CompilerParams(
            dimension_semantics=("parallel",)),
    )(*flat)

    side = int(np.sqrt(Nout))                                     # 64
    return out.reshape(B, 1, side, side)


# ----------------------------------------------------------------------------
# Parameter init (deterministic, synthetic)
# ----------------------------------------------------------------------------
def init_tcn_params(key, input_size, num_channels, kernel_size):
    keys = iter(jax.random.split(key, 128))

    def w_init(shape, s=0.1):
        return jax.random.normal(next(keys), shape, jnp.float32) * s

    blocks = []
    in_c = input_size
    for out_c in num_channels:
        blk = dict(
            w1=w_init((kernel_size, in_c, out_c)), b1=w_init((out_c,)),
            w2=w_init((kernel_size, out_c, out_c)), b2=w_init((out_c,)),
            bn1_gamma=jnp.ones((out_c,)), bn1_beta=jnp.zeros((out_c,)),
            bn1_mean=jnp.zeros((out_c,)), bn1_var=jnp.ones((out_c,)),
            bn2_gamma=jnp.ones((out_c,)), bn2_beta=jnp.zeros((out_c,)),
            bn2_mean=jnp.zeros((out_c,)), bn2_var=jnp.ones((out_c,)),
        )
        if in_c != out_c:
            blk["wd"] = w_init((1, in_c, out_c))
            blk["bd"] = w_init((out_c,))
        blocks.append(blk)
        in_c = out_c

    return dict(
        blocks=blocks,
        dec_w1=w_init((3, num_channels[-1], 64)), dec_b1=w_init((64,)),
        dec_w2=w_init((1, 64, 64 * 64)), dec_b2=w_init((64 * 64,)),
    )


if __name__ == "__main__":
    # Small config: input_size=4 channels, T=8 time steps, spatial 4x4,
    # num_channels=[8, 8], kernel_size=3, dropout=0.2 (identity in eval).
    B, T, C, H, W = 2, 8, 4, 4, 4
    input_size = C
    num_channels = [8, 8]
    kernel_size = 3

    x = jax.random.normal(jax.random.PRNGKey(0), (B, T, C, H, W), jnp.float32)
    params = init_tcn_params(jax.random.PRNGKey(1), input_size, num_channels,
                             kernel_size)

    out = tcn_forward(params, x, kernel_size)
    out = jax.block_until_ready(out)
    assert out.shape == (B, 1, 64, 64), out.shape
    assert bool(jnp.all(jnp.isfinite(out)))
    print("KERNEL_OK")
</pallas_src>

<mosaic_0001>
module attributes {stable_mosaic.version = 11 : i64} {
  func.func @_tcn_kernel(%arg0: i32, %arg1: memref<1x8x4xf32, #tpu.memory_space<vmem>>, %arg2: memref<3x4x8xbf16, #tpu.memory_space<vmem>>, %arg3: memref<1x8xf32, #tpu.memory_space<vmem>>, %arg4: memref<3x8x8xbf16, #tpu.memory_space<vmem>>, %arg5: memref<1x8xf32, #tpu.memory_space<vmem>>, %arg6: memref<4x8xbf16, #tpu.memory_space<vmem>>, %arg7: memref<1x8xf32, #tpu.memory_space<vmem>>, %arg8: memref<12x8xf32, #tpu.memory_space<vmem>>, %arg9: memref<3x8x8xbf16, #tpu.memory_space<vmem>>, %arg10: memref<1x8xf32, #tpu.memory_space<vmem>>, %arg11: memref<3x8x8xbf16, #tpu.memory_space<vmem>>, %arg12: memref<1x8xf32, #tpu.memory_space<vmem>>, %arg13: memref<20x12xf32, #tpu.memory_space<vmem>>, %arg14: memref<3x8x64xbf16, #tpu.memory_space<vmem>>, %arg15: memref<1x64xf32, #tpu.memory_space<vmem>>, %arg16: memref<64x4096xbf16, #tpu.memory_space<vmem>>, %arg17: memref<1x4096xf32, #tpu.memory_space<vmem>>, %arg18: memref<1x1x4096xf32, #tpu.memory_space<vmem>>, %arg19: memref<24x128xf32, #tpu.memory_space<vmem>>) attributes {dimension_semantics = [#tpu.dimension_semantics<parallel>], iteration_bounds = array<i64: 2>, scalar_prefetch = 0 : i64, scratch_operands = 1 : i64, tpu.core_type = #tpu.core_type<tc>, window_params = [{transform_indices = @transform_0, window_bounds = array<i64: 1, 8, 4>}, {pipeline_mode = #tpu.pipeline_mode<synchronous>, transform_indices = @transform_1, window_bounds = array<i64: 3, 4, 8>}, {pipeline_mode = #tpu.pipeline_mode<synchronous>, transform_indices = @transform_2, window_bounds = array<i64: 1, 8>}, {pipeline_mode = #tpu.pipeline_mode<synchronous>, transform_indices = @transform_3, window_bounds = array<i64: 3, 8, 8>}, {pipeline_mode = #tpu.pipeline_mode<synchronous>, transform_indices = @transform_4, window_bounds = array<i64: 1, 8>}, {pipeline_mode = #tpu.pipeline_mode<synchronous>, transform_indices = @transform_5, window_bounds = array<i64: 4, 8>}, {pipeline_mode = #tpu.pipeline_mode<synchronous>, transform_indices = @transform_6, window_bounds = array<i64: 1, 8>}, {pipeline_mode = #tpu.pipeline_mode<synchronous>, transform_indices = @transform_7, window_bounds = array<i64: 12, 8>}, {pipeline_mode = #tpu.pipeline_mode<synchronous>, transform_indices = @transform_8, window_bounds = array<i64: 3, 8, 8>}, {pipeline_mode = #tpu.pipeline_mode<synchronous>, transform_indices = @transform_9, window_bounds = array<i64: 1, 8>}, {pipeline_mode = #tpu.pipeline_mode<synchronous>, transform_indices = @transform_10, window_bounds = array<i64: 3, 8, 8>}, {pipeline_mode = #tpu.pipeline_mode<synchronous>, transform_indices = @transform_11, window_bounds = array<i64: 1, 8>}, {pipeline_mode = #tpu.pipeline_mode<synchronous>, transform_indices = @transform_12, window_bounds = array<i64: 20, 12>}, {pipeline_mode = #tpu.pipeline_mode<synchronous>, transform_indices = @transform_13, window_bounds = array<i64: 3, 8, 64>}, {pipeline_mode = #tpu.pipeline_mode<synchronous>, transform_indices = @transform_14, window_bounds = array<i64: 1, 64>}, {pipeline_mode = #tpu.pipeline_mode<synchronous>, transform_indices = @transform_15, window_bounds = array<i64: 64, 4096>}, {pipeline_mode = #tpu.pipeline_mode<synchronous>, transform_indices = @transform_16, window_bounds = array<i64: 1, 4096>}, {transform_indices = @transform_17, window_bounds = array<i64: 1, 1, 4096>}]} {
    %c0 = arith.constant 0 : index
    %c0_0 = arith.constant 0 : index
    %c0_1 = arith.constant 0 : index
    %0 = vector.load %arg1[%c0, %c0_0, %c0_1] : memref<1x8x4xf32, #tpu.memory_space<vmem>>, vector<1x8x4xf32>
    %1 = vector.shape_cast %0 : vector<1x8x4xf32> to vector<8x4xf32>
    %c0_2 = arith.constant 0 : index
    %c0_3 = arith.constant 0 : index
    %2 = vector.load %arg3[%c0_2, %c0_3] : memref<1x8xf32, #tpu.memory_space<vmem>>, vector<1x8xf32>
    %c0_4 = arith.constant 0 : index
    %c0_5 = arith.constant 0 : index
    %3 = vector.load %arg5[%c0_4, %c0_5] : memref<1x8xf32, #tpu.memory_space<vmem>>, vector<1x8xf32>
    %c0_6 = arith.constant 0 : index
    %c0_7 = arith.constant 0 : index
    %4 = vector.load %arg6[%c0_6, %c0_7] : memref<4x8xbf16, #tpu.memory_space<vmem>>, vector<4x8xbf16>
    %c0_8 = arith.constant 0 : index
    %c0_9 = arith.constant 0 : index
    %5 = vector.load %arg7[%c0_8, %c0_9] : memref<1x8xf32, #tpu.memory_space<vmem>>, vector<1x8xf32>
    %c0_10 = arith.constant 0 : index
    %c0_11 = arith.constant 0 : index
    %6 = vector.load %arg8[%c0_10, %c0_11] : memref<12x8xf32, #tpu.memory_space<vmem>>, vector<12x8xf32>
    %cst = arith.constant 0.000000e+00 : f32
    %7 = vector.broadcast %cst : f32 to vector<24x128xf32>
    %c0_12 = arith.constant 0 : index
    %c0_13 = arith.constant 0 : index
    %8 = vector.load %arg19[%c0_12, %c0_13] : memref<24x128xf32, #tpu.memory_space<vmem>>, vector<24x128xf32>
    tpu.vector_store %arg19[%c0_12, %c0_13], %7 {strides = array<i32>} : memref<24x128xf32, #tpu.memory_space<vmem>>, vector<24x128xf32>,
    %c2 = arith.constant 2 : index
    %c0_14 = arith.constant 0 : index
    %9 = vector.load %arg19[%c2, %c0_14] : memref<24x128xf32, #tpu.memory_space<vmem>>, vector<8x4xf32>
    tpu.vector_store %arg19[%c2, %c0_14], %1 {strides = array<i32>} : memref<24x128xf32, #tpu.memory_space<vmem>>, vector<8x4xf32>,
    %c0_15 = arith.constant 0 : index
    %c0_16 = arith.constant 0 : index
    %10 = vector.load %arg19[%c0_15, %c0_16] : memref<24x128xf32, #tpu.memory_space<vmem>>, vector<12x4xf32>
    %cst_17 = arith.constant 0.000000e+00 : f32
    %11 = vector.broadcast %cst_17 : f32 to vector<10x8xf32>
    %12 = vector.extract_strided_slice %10 {offsets = [0, 0], sizes = [10, 4], strides = [1, 1]} : vector<12x4xf32> to vector<10x4xf32>
    %13 = arith.truncf %12 : vector<10x4xf32> to vector<10x4xbf16>
    %c0_18 = arith.constant 0 : index
    %c0_19 = arith.constant 0 : index
    %c0_20 = arith.constant 0 : index
    %14 = vector.load %arg2[%c0_18, %c0_19, %c0_20] : memref<3x4x8xbf16, #tpu.memory_space<vmem>>, vector<1x4x8xbf16>
    %15 = vector.shape_cast %14 : vector<1x4x8xbf16> to vector<4x8xbf16>
    %cst_21 = arith.constant dense<0.000000e+00> : vector<10x8xf32>
    %16 = tpu.matmul %13, %15, %cst_21 {dimension_numbers = #tpu.dot_dimension_numbers<[1], [0], [0], [1], [0, 0, 1, 1], [], []>} : vector<10x4xbf16>, vector<4x8xbf16>, vector<10x8xf32> -> vector<10x8xf32>
    %17 = arith.addf %11, %16 : vector<10x8xf32>
    %18 = vector.extract_strided_slice %10 {offsets = [1, 0], sizes = [10, 4], strides = [1, 1]} : vector<12x4xf32> to vector<10x4xf32>
    %19 = arith.truncf %18 : vector<10x4xf32> to vector<10x4xbf16>
    %c1 = arith.constant 1 : index
    %c0_22 = arith.constant 0 : index
    %c0_23 = arith.constant 0 : index
    %20 = vector.load %arg2[%c1, %c0_22, %c0_23] : memref<3x4x8xbf16, #tpu.memory_space<vmem>>, vector<1x4x8xbf16>
    %21 = vector.shape_cast %20 : vector<1x4x8xbf16> to vector<4x8xbf16>
    %cst_24 = arith.constant dense<0.000000e+00> : vector<10x8xf32>
    %22 = tpu.matmul %19, %21, %cst_24 {dimension_numbers = #tpu.dot_dimension_numbers<[1], [0], [0], [1], [0, 0, 1, 1], [], []>} : vector<10x4xbf16>, vector<4x8xbf16>, vector<10x8xf32> -> vector<10x8xf32>
    %23 = arith.addf %17, %22 : vector<10x8xf32>
    %24 = vector.extract_strided_slice %10 {offsets = [2, 0], sizes = [10, 4], strides = [1, 1]} : vector<12x4xf32> to vector<10x4xf32>
    %25 = arith.truncf %24 : vector<10x4xf32> to vector<10x4xbf16>
    %c2_25 = arith.constant 2 : index
    %c0_26 = arith.constant 0 : index
    %c0_27 = arith.constant 0 : index
    %26 = vector.load %arg2[%c2_25, %c0_26, %c0_27] : memref<3x4x8xbf16, #tpu.memory_space<vmem>>, vector<1x4x8xbf16>
    %27 = vector.shape_cast %26 : vector<1x4x8xbf16> to vector<4x8xbf16>
    %cst_28 = arith.constant dense<0.000000e+00> : vector<10x8xf32>
    %28 = tpu.matmul %25, %27, %cst_28 {dimension_numbers = #tpu.dot_dimension_numbers<[1], [0], [0], [1], [0, 0, 1, 1], [], []>} : vector<10x4xbf16>, vector<4x8xbf16>, vector<10x8xf32> -> vector<10x8xf32>
    %29 = arith.addf %23, %28 : vector<10x8xf32>
    %30 = vector.broadcast %2 : vector<1x8xf32> to vector<10x8xf32>
    %31 = arith.addf %29, %30 : vector<10x8xf32>
    %cst_29 = arith.constant 0.000000e+00 : f32
    %32 = vector.broadcast %cst_29 : f32 to vector<10x8xf32>
    %33 = arith.maximumf %31, %32 : vector<10x8xf32>
    %34 = arith.truncf %1 : vector<8x4xf32> to vector<8x4xbf16>
    %cst_30 = arith.constant dense<0.000000e+00> : vector<8x8xf32>
    %35 = tpu.matmul %34, %4, %cst_30 {dimension_numbers = #tpu.dot_dimension_numbers<[1], [0], [0], [1], [0, 0, 1, 1], [], []>} : vector<8x4xbf16>, vector<4x8xbf16>, vector<8x8xf32> -> vector<8x8xf32>
    %36 = vector.broadcast %5 : vector<1x8xf32> to vector<8x8xf32>
    %37 = arith.addf %35, %36 : vector<8x8xf32>
    %cst_31 = arith.constant dense<0.000000e+00> : vector<12x8xf32>
    %38 = tpu.matmul %6, %37, %cst_31 {dimension_numbers = #tpu.dot_dimension_numbers<[1], [0], [0], [1], [0, 0, 1, 1], [], []>} : vector<12x8xf32>, vector<8x8xf32>, vector<12x8xf32> -> vector<12x8xf32>
    %cst_32 = arith.constant 0.000000e+00 : f32
    %39 = vector.broadcast %cst_32 : f32 to vector<24x128xf32>
    %c0_33 = arith.constant 0 : index
    %c0_34 = arith.constant 0 : index
    %40 = vector.load %arg19[%c0_33, %c0_34] : memref<24x128xf32, #tpu.memory_space<vmem>>, vector<24x128xf32>
    tpu.vector_store %arg19[%c0_33, %c0_34], %39 {strides = array<i32>} : memref<24x128xf32, #tpu.memory_space<vmem>>, vector<24x128xf32>,
    %c2_35 = arith.constant 2 : index
    %c0_36 = arith.constant 0 : index
    %41 = vector.load %arg19[%c2_35, %c0_36] : memref<24x128xf32, #tpu.memory_space<vmem>>, vector<10x8xf32>
    tpu.vector_store %arg19[%c2_35, %c0_36], %33 {strides = array<i32>} : memref<24x128xf32, #tpu.memory_space<vmem>>, vector<10x8xf32>,
    %c0_37 = arith.constant 0 : index
    %c0_38 = arith.constant 0 : index
    %42 = vector.load %arg19[%c0_37, %c0_38] : memref<24x128xf32, #tpu.memory_space<vmem>>, vector<14x8xf32>
    %cst_39 = arith.constant 0.000000e+00 : f32
    %43 = vector.broadcast %cst_39 : f32 to vector<12x8xf32>
    %44 = vector.extract_strided_slice %42 {offsets = [0, 0], sizes = [12, 8], strides = [1, 1]} : vector<14x8xf32> to vector<12x8xf32>
    %45 = arith.truncf %44 : vector<12x8xf32> to vector<12x8xbf16>
    %c0_40 = arith.constant 0 : index
    %c0_41 = arith.constant 0 : index
    %c0_42 = arith.constant 0 : index
    %46 = vector.load %arg4[%c0_40, %c0_41, %c0_42] : memref<3x8x8xbf16, #tpu.memory_space<vmem>>, vector<1x8x8xbf16>
    %47 = vector.shape_cast %46 : vector<1x8x8xbf16> to vector<8x8xbf16>
    %cst_43 = arith.constant dense<0.000000e+00> : vector<12x8xf32>
    %48 = tpu.matmul %45, %47, %cst_43 {dimension_numbers = #tpu.dot_dimension_numbers<[1], [0], [0], [1], [0, 0, 1, 1], [], []>} : vector<12x8xbf16>, vector<8x8xbf16>, vector<12x8xf32> -> vector<12x8xf32>
    %49 = arith.addf %43, %48 : vector<12x8xf32>
    %50 = vector.extract_strided_slice %42 {offsets = [1, 0], sizes = [12, 8], strides = [1, 1]} : vector<14x8xf32> to vector<12x8xf32>
    %51 = arith.truncf %50 : vector<12x8xf32> to vector<12x8xbf16>
    %c1_44 = arith.constant 1 : index
    %c0_45 = arith.constant 0 : index
    %c0_46 = arith.constant 0 : index
    %52 = vector.load %arg4[%c1_44, %c0_45, %c0_46] : memref<3x8x8xbf16, #tpu.memory_space<vmem>>, vector<1x8x8xbf16>
    %53 = vector.shape_cast %52 : vector<1x8x8xbf16> to vector<8x8xbf16>
    %cst_47 = arith.constant dense<0.000000e+00> : vector<12x8xf32>
    %54 = tpu.matmul %51, %53, %cst_47 {dimension_numbers = #tpu.dot_dimension_numbers<[1], [0], [0], [1], [0, 0, 1, 1], [], []>} : vector<12x8xbf16>, vector<8x8xbf16>, vector<12x8xf32> -> vector<12x8xf32>
    %55 = arith.addf %49, %54 : vector<12x8xf32>
    %56 = vector.extract_strided_slice %42 {offsets = [2, 0], sizes = [12, 8], strides = [1, 1]} : vector<14x8xf32> to vector<12x8xf32>
    %57 = arith.truncf %56 : vector<12x8xf32> to vector<12x8xbf16>
    %c2_48 = arith.constant 2 : index
    %c0_49 = arith.constant 0 : index
    %c0_50 = arith.constant 0 : index
    %58 = vector.load %arg4[%c2_48, %c0_49, %c0_50] : memref<3x8x8xbf16, #tpu.memory_space<vmem>>, vector<1x8x8xbf16>
    %59 = vector.shape_cast %58 : vector<1x8x8xbf16> to vector<8x8xbf16>
    %cst_51 = arith.constant dense<0.000000e+00> : vector<12x8xf32>
    %60 = tpu.matmul %57, %59, %cst_51 {dimension_numbers = #tpu.dot_dimension_numbers<[1], [0], [0], [1], [0, 0, 1, 1], [], []>} : vector<12x8xbf16>, vector<8x8xbf16>, vector<12x8xf32> -> vector<12x8xf32>
    %61 = arith.addf %55, %60 : vector<12x8xf32>
    %62 = vector.broadcast %3 : vector<1x8xf32> to vector<12x8xf32>
    %63 = arith.addf %61, %62 : vector<12x8xf32>
    %cst_52 = arith.constant 0.000000e+00 : f32
    %64 = vector.broadcast %cst_52 : f32 to vector<12x8xf32>
    %65 = arith.maximumf %63, %64 : vector<12x8xf32>
    %66 = arith.addf %65, %38 : vector<12x8xf32>
    %cst_53 = arith.constant 0.000000e+00 : f32
    %67 = vector.broadcast %cst_53 : f32 to vector<12x8xf32>
    %68 = arith.maximumf %66, %67 : vector<12x8xf32>
    %c0_54 = arith.constant 0 : index
    %c0_55 = arith.constant 0 : index
    %69 = vector.load %arg10[%c0_54, %c0_55] : memref<1x8xf32, #tpu.memory_space<vmem>>, vector<1x8xf32>
    %c0_56 = arith.constant 0 : index
    %c0_57 = arith.constant 0 : index
    %70 = vector.load %arg12[%c0_56, %c0_57] : memref<1x8xf32, #tpu.memory_space<vmem>>, vector<1x8xf32>
    %c0_58 = arith.constant 0 : index
    %c0_59 = arith.constant 0 : index
    %71 = vector.load %arg13[%c0_58, %c0_59] : memref<20x12xf32, #tpu.memory_space<vmem>>, vector<20x12xf32>
    %cst_60 = arith.constant 0.000000e+00 : f32
    %72 = vector.broadcast %cst_60 : f32 to vector<24x128xf32>
    %c0_61 = arith.constant 0 : index
    %c0_62 = arith.constant 0 : index
    %73 = vector.load %arg19[%c0_61, %c0_62] : memref<24x128xf32, #tpu.memory_space<vmem>>, vector<24x128xf32>
    tpu.vector_store %arg19[%c0_61, %c0_62], %72 {strides = array<i32>} : memref<24x128xf32, #tpu.memory_space<vmem>>, vector<24x128xf32>,
    %c4 = arith.constant 4 : index
    %c0_63 = arith.constant 0 : index
    %74 = vector.load %arg19[%c4, %c0_63] : memref<24x128xf32, #tpu.memory_space<vmem>>, vector<12x8xf32>
    tpu.vector_store %arg19[%c4, %c0_63], %68 {strides = array<i32>} : memref<24x128xf32, #tpu.memory_space<vmem>>, vector<12x8xf32>,
    %c0_64 = arith.constant 0 : index
    %c0_65 = arith.constant 0 : index
    %75 = vector.load %arg19[%c0_64, %c0_65] : memref<24x128xf32, #tpu.memory_space<vmem>>, vector<20x8xf32>
    %cst_66 = arith.constant 0.000000e+00 : f32
    %76 = vector.broadcast %cst_66 : f32 to vector<16x8xf32>
    %77 = vector.extract_strided_slice %75 {offsets = [0, 0], sizes = [16, 8], strides = [1, 1]} : vector<20x8xf32> to vector<16x8xf32>
    %78 = arith.truncf %77 : vector<16x8xf32> to vector<16x8xbf16>
    %c0_67 = arith.constant 0 : index
    %c0_68 = arith.constant 0 : index
    %c0_69 = arith.constant 0 : index
    %79 = vector.load %arg9[%c0_67, %c0_68, %c0_69] : memref<3x8x8xbf16, #tpu.memory_space<vmem>>, vector<1x8x8xbf16>
    %80 = vector.shape_cast %79 : vector<1x8x8xbf16> to vector<8x8xbf16>
    %cst_70 = arith.constant dense<0.000000e+00> : vector<16x8xf32>
    %81 = tpu.matmul %78, %80, %cst_70 {dimension_numbers = #tpu.dot_dimension_numbers<[1], [0], [0], [1], [0, 0, 1, 1], [], []>} : vector<16x8xbf16>, vector<8x8xbf16>, vector<16x8xf32> -> vector<16x8xf32>
    %82 = arith.addf %76, %81 : vector<16x8xf32>
    %83 = vector.extract_strided_slice %75 {offsets = [2, 0], sizes = [16, 8], strides = [1, 1]} : vector<20x8xf32> to vector<16x8xf32>
    %84 = arith.truncf %83 : vector<16x8xf32> to vector<16x8xbf16>
    %c1_71 = arith.constant 1 : index
    %c0_72 = arith.constant 0 : index
    %c0_73 = arith.constant 0 : index
    %85 = vector.load %arg9[%c1_71, %c0_72, %c0_73] : memref<3x8x8xbf16, #tpu.memory_space<vmem>>, vector<1x8x8xbf16>
    %86 = vector.shape_cast %85 : vector<1x8x8xbf16> to vector<8x8xbf16>
    %cst_74 = arith.constant dense<0.000000e+00> : vector<16x8xf32>
    %87 = tpu.matmul %84, %86, %cst_74 {dimension_numbers = #tpu.dot_dimension_numbers<[1], [0], [0], [1], [0, 0, 1, 1], [], []>} : vector<16x8xbf16>, vector<8x8xbf16>, vector<16x8xf32> -> vector<16x8xf32>
    %88 = arith.addf %82, %87 : vector<16x8xf32>
    %89 = vector.extract_strided_slice %75 {offsets = [4, 0], sizes = [16, 8], strides = [1, 1]} : vector<20x8xf32> to vector<16x8xf32>
    %90 = arith.truncf %89 : vector<16x8xf32> to vector<16x8xbf16>
    %c2_75 = arith.constant 2 : index
    %c0_76 = arith.constant 0 : index
    %c0_77 = arith.constant 0 : index
    %91 = vector.load %arg9[%c2_75, %c0_76, %c0_77] : memref<3x8x8xbf16, #tpu.memory_space<vmem>>, vector<1x8x8xbf16>
    %92 = vector.shape_cast %91 : vector<1x8x8xbf16> to vector<8x8xbf16>
    %cst_78 = arith.constant dense<0.000000e+00> : vector<16x8xf32>
    %93 = tpu.matmul %90, %92, %cst_78 {dimension_numbers = #tpu.dot_dimension_numbers<[1], [0], [0], [1], [0, 0, 1, 1], [], []>} : vector<16x8xbf16>, vector<8x8xbf16>, vector<16x8xf32> -> vector<16x8xf32>
    %94 = arith.addf %88, %93 : vector<16x8xf32>
    %95 = vector.broadcast %69 : vector<1x8xf32> to vector<16x8xf32>
    %96 = arith.addf %94, %95 : vector<16x8xf32>
    %cst_79 = arith.constant 0.000000e+00 : f32
    %97 = vector.broadcast %cst_79 : f32 to vector<16x8xf32>
    %98 = arith.maximumf %96, %97 : vector<16x8xf32>
    %cst_80 = arith.constant dense<0.000000e+00> : vector<20x8xf32>
    %99 = tpu.matmul %71, %68, %cst_80 {dimension_numbers = #tpu.dot_dimension_numbers<[1], [0], [0], [1], [0, 0, 1, 1], [], []>} : vector<20x12xf32>, vector<12x8xf32>, vector<20x8xf32> -> vector<20x8xf32>
    %cst_81 = arith.constant 0.000000e+00 : f32
    %100 = vector.broadcast %cst_81 : f32 to vector<24x128xf32>
    %c0_82 = arith.constant 0 : index
    %c0_83 = arith.constant 0 : index
    %101 = vector.load %arg19[%c0_82, %c0_83] : memref<24x128xf32, #tpu.memory_space<vmem>>, vector<24x128xf32>
    tpu.vector_store %arg19[%c0_82, %c0_83], %100 {strides = array<i32>} : memref<24x128xf32, #tpu.memory_space<vmem>>, vector<24x128xf32>,
    %c4_84 = arith.constant 4 : index
    %c0_85 = arith.constant 0 : index
    %102 = vector.load %arg19[%c4_84, %c0_85] : memref<24x128xf32, #tpu.memory_space<vmem>>, vector<16x8xf32>
    tpu.vector_store %arg19[%c4_84, %c0_85], %98 {strides = array<i32>} : memref<24x128xf32, #tpu.memory_space<vmem>>, vector<16x8xf32>,
    %c0_86 = arith.constant 0 : index
    %c0_87 = arith.constant 0 : index
    %103 = vector.load %arg19[%c0_86, %c0_87] : memref<24x128xf32, #tpu.memory_space<vmem>>, vector<24x8xf32>
    %cst_88 = arith.constant 0.000000e+00 : f32
    %104 = vector.broadcast %cst_88 : f32 to vector<20x8xf32>
    %105 = vector.extract_strided_slice %103 {offsets = [0, 0], sizes = [20, 8], strides = [1, 1]} : vector<24x8xf32> to vector<20x8xf32>
    %106 = arith.truncf %105 : vector<20x8xf32> to vector<20x8xbf16>
    %c0_89 = arith.constant 0 : index
    %c0_90 = arith.constant 0 : index
    %c0_91 = arith.constant 0 : index
    %107 = vector.load %arg11[%c0_89, %c0_90, %c0_91] : memref<3x8x8xbf16, #tpu.memory_space<vmem>>, vector<1x8x8xbf16>
    %108 = vector.shape_cast %107 : vector<1x8x8xbf16> to vector<8x8xbf16>
    %cst_92 = arith.constant dense<0.000000e+00> : vector<20x8xf32>
    %109 = tpu.matmul %106, %108, %cst_92 {dimension_numbers = #tpu.dot_dimension_numbers<[1], [0], [0], [1], [0, 0, 1, 1], [], []>} : vector<20x8xbf16>, vector<8x8xbf16>, vector<20x8xf32> -> vector<20x8xf32>
    %110 = arith.addf %104, %109 : vector<20x8xf32>
    %111 = vector.extract_strided_slice %103 {offsets = [2, 0], sizes = [20, 8], strides = [1, 1]} : vector<24x8xf32> to vector<20x8xf32>
    %112 = arith.truncf %111 : vector<20x8xf32> to vector<20x8xbf16>
    %c1_93 = arith.constant 1 : index
    %c0_94 = arith.constant 0 : index
    %c0_95 = arith.constant 0 : index
    %113 = vector.load %arg11[%c1_93, %c0_94, %c0_95] : memref<3x8x8xbf16, #tpu.memory_space<vmem>>, vector<1x8x8xbf16>
    %114 = vector.shape_cast %113 : vector<1x8x8xbf16> to vector<8x8xbf16>
    %cst_96 = arith.constant dense<0.000000e+00> : vector<20x8xf32>
    %115 = tpu.matmul %112, %114, %cst_96 {dimension_numbers = #tpu.dot_dimension_numbers<[1], [0], [0], [1], [0, 0, 1, 1], [], []>} : vector<20x8xbf16>, vector<8x8xbf16>, vector<20x8xf32> -> vector<20x8xf32>
    %116 = arith.addf %110, %115 : vector<20x8xf32>
    %117 = vector.extract_strided_slice %103 {offsets = [4, 0], sizes = [20, 8], strides = [1, 1]} : vector<24x8xf32> to vector<20x8xf32>
    %118 = arith.truncf %117 : vector<20x8xf32> to vector<20x8xbf16>
    %c2_97 = arith.constant 2 : index
    %c0_98 = arith.constant 0 : index
    %c0_99 = arith.constant 0 : index
    %119 = vector.load %arg11[%c2_97, %c0_98, %c0_99] : memref<3x8x8xbf16, #tpu.memory_space<vmem>>, vector<1x8x8xbf16>
    %120 = vector.shape_cast %119 : vector<1x8x8xbf16> to vector<8x8xbf16>
    %cst_100 = arith.constant dense<0.000000e+00> : vector<20x8xf32>
    %121 = tpu.matmul %118, %120, %cst_100 {dimension_numbers = #tpu.dot_dimension_numbers<[1], [0], [0], [1], [0, 0, 1, 1], [], []>} : vector<20x8xbf16>, vector<8x8xbf16>, vector<20x8xf32> -> vector<20x8xf32>
    %122 = arith.addf %116, %121 : vector<20x8xf32>
    %123 = vector.broadcast %70 : vector<1x8xf32> to vector<20x8xf32>
    %124 = arith.addf %122, %123 : vector<20x8xf32>
    %cst_101 = arith.constant 0.000000e+00 : f32
    %125 = vector.broadcast %cst_101 : f32 to vector<20x8xf32>
    %126 = arith.maximumf %124, %125 : vector<20x8xf32>
    %127 = arith.addf %126, %99 : vector<20x8xf32>
    %cst_102 = arith.constant 0.000000e+00 : f32
    %128 = vector.broadcast %cst_102 : f32 to vector<20x8xf32>
    %129 = arith.maximumf %127, %128 : vector<20x8xf32>
    %c0_103 = arith.constant 0 : index
    %c0_104 = arith.constant 0 : index
    %130 = vector.load %arg15[%c0_103, %c0_104] : memref<1x64xf32, #tpu.memory_space<vmem>>, vector<1x64xf32>
    %c0_105 = arith.constant 0 : index
    %c0_106 = arith.constant 0 : index
    %131 = vector.load %arg16[%c0_105, %c0_106] : memref<64x4096xbf16, #tpu.memory_space<vmem>>, vector<64x4096xbf16>
    %c0_107 = arith.constant 0 : index
    %c0_108 = arith.constant 0 : index
    %132 = vector.load %arg17[%c0_107, %c0_108] : memref<1x4096xf32, #tpu.memory_space<vmem>>, vector<1x4096xf32>
    %cst_109 = arith.constant 0.000000e+00 : f32
    %133 = vector.broadcast %cst_109 : f32 to vector<24x128xf32>
    %c0_110 = arith.constant 0 : index
    %c0_111 = arith.constant 0 : index
    %134 = vector.load %arg19[%c0_110, %c0_111] : memref<24x128xf32, #tpu.memory_space<vmem>>, vector<24x128xf32>
    tpu.vector_store %arg19[%c0_110, %c0_111], %133 {strides = array<i32>} : memref<24x128xf32, #tpu.memory_space<vmem>>, vector<24x128xf32>,
    %c1_112 = arith.constant 1 : index
    %c0_113 = arith.constant 0 : index
    %135 = vector.load %arg19[%c1_112, %c0_113] : memref<24x128xf32, #tpu.memory_space<vmem>>, vector<20x8xf32>
    tpu.vector_store %arg19[%c1_112, %c0_113], %129 {strides = array<i32>} : memref<24x128xf32, #tpu.memory_space<vmem>>, vector<20x8xf32>,
    %c0_114 = arith.constant 0 : index
    %c0_115 = arith.constant 0 : index
    %136 = vector.load %arg19[%c0_114, %c0_115] : memref<24x128xf32, #tpu.memory_space<vmem>>, vector<22x8xf32>
    %cst_116 = arith.constant 0.000000e+00 : f32
    %137 = vector.broadcast %cst_116 : f32 to vector<20x64xf32>
    %138 = vector.extract_strided_slice %136 {offsets = [0, 0], sizes = [20, 8], strides = [1, 1]} : vector<22x8xf32> to vector<20x8xf32>
    %139 = arith.truncf %138 : vector<20x8xf32> to vector<20x8xbf16>
    %c0_117 = arith.constant 0 : index
    %c0_118 = arith.constant 0 : index
    %c0_119 = arith.constant 0 : index
    %140 = vector.load %arg14[%c0_117, %c0_118, %c0_119] : memref<3x8x64xbf16, #tpu.memory_space<vmem>>, vector<1x8x64xbf16>
    %141 = vector.shape_cast %140 : vector<1x8x64xbf16> to vector<8x64xbf16>
    %cst_120 = arith.constant dense<0.000000e+00> : vector<20x64xf32>
    %142 = tpu.matmul %139, %141, %cst_120 {dimension_numbers = #tpu.dot_dimension_numbers<[1], [0], [0], [1], [0, 0, 1, 1], [], []>} : vector<20x8xbf16>, vector<8x64xbf16>, vector<20x64xf32> -> vector<20x64xf32>
    %143 = arith.addf %137, %142 : vector<20x64xf32>
    %144 = vector.extract_strided_slice %136 {offsets = [1, 0], sizes = [20, 8], strides = [1, 1]} : vector<22x8xf32> to vector<20x8xf32>
    %145 = arith.truncf %144 : vector<20x8xf32> to vector<20x8xbf16>
    %c1_121 = arith.constant 1 : index
    %c0_122 = arith.constant 0 : index
    %c0_123 = arith.constant 0 : index
    %146 = vector.load %arg14[%c1_121, %c0_122, %c0_123] : memref<3x8x64xbf16, #tpu.memory_space<vmem>>, vector<1x8x64xbf16>
    %147 = vector.shape_cast %146 : vector<1x8x64xbf16> to vector<8x64xbf16>
    %cst_124 = arith.constant dense<0.000000e+00> : vector<20x64xf32>
    %148 = tpu.matmul %145, %147, %cst_124 {dimension_numbers = #tpu.dot_dimension_numbers<[1], [0], [0], [1], [0, 0, 1, 1], [], []>} : vector<20x8xbf16>, vector<8x64xbf16>, vector<20x64xf32> -> vector<20x64xf32>
    %149 = arith.addf %143, %148 : vector<20x64xf32>
    %150 = vector.extract_strided_slice %136 {offsets = [2, 0], sizes = [20, 8], strides = [1, 1]} : vector<22x8xf32> to vector<20x8xf32>
    %151 = arith.truncf %150 : vector<20x8xf32> to vector<20x8xbf16>
    %c2_125 = arith.constant 2 : index
    %c0_126 = arith.constant 0 : index
    %c0_127 = arith.constant 0 : index
    %152 = vector.load %arg14[%c2_125, %c0_126, %c0_127] : memref<3x8x64xbf16, #tpu.memory_space<vmem>>, vector<1x8x64xbf16>
    %153 = vector.shape_cast %152 : vector<1x8x64xbf16> to vector<8x64xbf16>
    %cst_128 = arith.constant dense<0.000000e+00> : vector<20x64xf32>
    %154 = tpu.matmul %151, %153, %cst_128 {dimension_numbers = #tpu.dot_dimension_numbers<[1], [0], [0], [1], [0, 0, 1, 1], [], []>} : vector<20x8xbf16>, vector<8x64xbf16>, vector<20x64xf32> -> vector<20x64xf32>
    %155 = arith.addf %149, %154 : vector<20x64xf32>
    %156 = vector.broadcast %130 : vector<1x64xf32> to vector<20x64xf32>
    %157 = arith.addf %155, %156 : vector<20x64xf32>
    %cst_129 = arith.constant 0.000000e+00 : f32
    %158 = vector.broadcast %cst_129 : f32 to vector<20x64xf32>
    %159 = arith.maximumf %157, %158 : vector<20x64xf32>
    %cst_130 = arith.constant 5.000000e-02 : f32
    %160 = vector.broadcast %cst_130 : f32 to vector<1x20xf32>
    %cst_131 = arith.constant dense<0.000000e+00> : vector<1x64xf32>
    %161 = tpu.matmul %160, %159, %cst_131 {dimension_numbers = #tpu.dot_dimension_numbers<[1], [0], [0], [1], [0, 0, 1, 1], [], []>} : vector<1x20xf32>, vector<20x64xf32>, vector<1x64xf32> -> vector<1x64xf32>
    %162 = arith.truncf %161 : vector<1x64xf32> to vector<1x64xbf16>
    %cst_132 = arith.constant dense<0.000000e+00> : vector<1x4096xf32>
    %163 = tpu.matmul %162, %131, %cst_132 {dimension_numbers = #tpu.dot_dimension_numbers<[1], [0], [0], [1], [0, 0, 1, 1], [], []>} : vector<1x64xbf16>, vector<64x4096xbf16>, vector<1x4096xf32> -> vector<1x4096xf32>
    %164 = arith.addf %163, %132 : vector<1x4096xf32>
    %c0_133 = arith.constant 0 : index
    %c0_134 = arith.constant 0 : index
    %c0_135 = arith.constant 0 : index
    %165 = vector.load %arg18[%c0_133, %c0_134, %c0_135] : memref<1x1x4096xf32, #tpu.memory_space<vmem>>, vector<1x1x4096xf32>
    %166 = vector.shape_cast %165 : vector<1x1x4096xf32> to vector<1x4096xf32>
    %167 = vector.shape_cast %164 : vector<1x4096xf32> to vector<1x1x4096xf32>
    tpu.vector_store %arg18[%c0_133, %c0_134, %c0_135], %167 {strides = array<i32>} : memref<1x1x4096xf32, #tpu.memory_space<vmem>>, vector<1x1x4096xf32>,
    return
  }
  func.func @transform_0(%arg0: i32) -> (i32, i32, i32) {
    %c0_i32 = arith.constant 0 : i32
    %c0_i32_0 = arith.constant 0 : i32
    %c0_i32_1 = arith.constant 0 : i32
    return %arg0, %c0_i32, %c0_i32_0 : i32, i32, i32
  }
  func.func @transform_1(%arg0: i32) -> (i32, i32, i32) {
    %c0_i32 = arith.constant 0 : i32
    %c0_i32_0 = arith.constant 0 : i32
    %c0_i32_1 = arith.constant 0 : i32
    %c0_i32_2 = arith.constant 0 : i32
    return %c0_i32, %c0_i32_0, %c0_i32_1 : i32, i32, i32
  }
  func.func @transform_2(%arg0: i32) -> (i32, i32) {
    %c0_i32 = arith.constant 0 : i32
    %c0_i32_0 = arith.constant 0 : i32
    %c0_i32_1 = arith.constant 0 : i32
    return %c0_i32, %c0_i32_0 : i32, i32
  }
  func.func @transform_3(%arg0: i32) -> (i32, i32, i32) {
    %c0_i32 = arith.constant 0 : i32
    %c0_i32_0 = arith.constant 0 : i32
    %c0_i32_1 = arith.constant 0 : i32
    %c0_i32_2 = arith.constant 0 : i32
    return %c0_i32, %c0_i32_0, %c0_i32_1 : i32, i32, i32
  }
  func.func @transform_4(%arg0: i32) -> (i32, i32) {
    %c0_i32 = arith.constant 0 : i32
    %c0_i32_0 = arith.constant 0 : i32
    %c0_i32_1 = arith.constant 0 : i32
    return %c0_i32, %c0_i32_0 : i32, i32
  }
  func.func @transform_5(%arg0: i32) -> (i32, i32) {
    %c0_i32 = arith.constant 0 : i32
    %c0_i32_0 = arith.constant 0 : i32
    %c0_i32_1 = arith.constant 0 : i32
    return %c0_i32, %c0_i32_0 : i32, i32
  }
  func.func @transform_6(%arg0: i32) -> (i32, i32) {
    %c0_i32 = arith.constant 0 : i32
    %c0_i32_0 = arith.constant 0 : i32
    %c0_i32_1 = arith.constant 0 : i32
    return %c0_i32, %c0_i32_0 : i32, i32
  }
  func.func @transform_7(%arg0: i32) -> (i32, i32) {
    %c0_i32 = arith.constant 0 : i32
    %c0_i32_0 = arith.constant 0 : i32
    %c0_i32_1 = arith.constant 0 : i32
    return %c0_i32, %c0_i32_0 : i32, i32
  }
  func.func @transform_8(%arg0: i32) -> (i32, i32, i32) {
    %c0_i32 = arith.constant 0 : i32
    %c0_i32_0 = arith.constant 0 : i32
    %c0_i32_1 = arith.constant 0 : i32
    %c0_i32_2 = arith.constant 0 : i32
    return %c0_i32, %c0_i32_0, %c0_i32_1 : i32, i32, i32
  }
  func.func @transform_9(%arg0: i32) -> (i32, i32) {
    %c0_i32 = arith.constant 0 : i32
    %c0_i32_0 = arith.constant 0 : i32
    %c0_i32_1 = arith.constant 0 : i32
    return %c0_i32, %c0_i32_0 : i32, i32
  }
  func.func @transform_10(%arg0: i32) -> (i32, i32, i32) {
    %c0_i32 = arith.constant 0 : i32
    %c0_i32_0 = arith.constant 0 : i32
    %c0_i32_1 = arith.constant 0 : i32
    %c0_i32_2 = arith.constant 0 : i32
    return %c0_i32, %c0_i32_0, %c0_i32_1 : i32, i32, i32
  }
  func.func @transform_11(%arg0: i32) -> (i32, i32) {
    %c0_i32 = arith.constant 0 : i32
    %c0_i32_0 = arith.constant 0 : i32
    %c0_i32_1 = arith.constant 0 : i32
    return %c0_i32, %c0_i32_0 : i32, i32
  }
  func.func @transform_12(%arg0: i32) -> (i32, i32) {
    %c0_i32 = arith.constant 0 : i32
    %c0_i32_0 = arith.constant 0 : i32
    %c0_i32_1 = arith.constant 0 : i32
    return %c0_i32, %c0_i32_0 : i32, i32
  }
  func.func @transform_13(%arg0: i32) -> (i32, i32, i32) {
    %c0_i32 = arith.constant 0 : i32
    %c0_i32_0 = arith.constant 0 : i32
    %c0_i32_1 = arith.constant 0 : i32
    %c0_i32_2 = arith.constant 0 : i32
    return %c0_i32, %c0_i32_0, %c0_i32_1 : i32, i32, i32
  }
  func.func @transform_14(%arg0: i32) -> (i32, i32) {
    %c0_i32 = arith.constant 0 : i32
    %c0_i32_0 = arith.constant 0 : i32
    %c0_i32_1 = arith.constant 0 : i32
    return %c0_i32, %c0_i32_0 : i32, i32
  }
  func.func @transform_15(%arg0: i32) -> (i32, i32) {
    %c0_i32 = arith.constant 0 : i32
    %c0_i32_0 = arith.constant 0 : i32
    %c0_i32_1 = arith.constant 0 : i32
    return %c0_i32, %c0_i32_0 : i32, i32
  }
  func.func @transform_16(%arg0: i32) -> (i32, i32) {
    %c0_i32 = arith.constant 0 : i32
    %c0_i32_0 = arith.constant 0 : i32
    %c0_i32_1 = arith.constant 0 : i32
    return %c0_i32, %c0_i32_0 : i32, i32
  }
  func.func @transform_17(%arg0: i32) -> (i32, i32, i32) {
    %c0_i32 = arith.constant 0 : i32
    %c0_i32_0 = arith.constant 0 : i32
    %c0_i32_1 = arith.constant 0 : i32
    return %arg0, %c0_i32, %c0_i32_0 : i32, i32, i32
  }
}

</mosaic_0001>

<bundles_post_ra>
// kernel: tpu_custom_call.1
= control target key start
LH: loop header
LB: loop body
LE: loop exit
PB: predicated region body
PF: predicated region fallthrough
CT: control target
= control target key end

     0   :  { %s4407_s0 = inlined_call_operand.vmem [shape: f32[2,8,4], index: 0, kind: input, shape index: {}]   ;;  %s4408_s1 = inlined_call_operand.hbm [shape: bf16[3,4,8], index: 1, kind: input, shape index: {}]   ;;  %s4409_s2 = inlined_call_operand.vmem [shape: f32[1,8], index: 2, kind: input, shape index: {}]   ;;  %s4410_s3 = inlined_call_operand.vmem [shape: bf16[3,8,8], index: 3, kind: input, shape index: {}]   ;;  %s4411_s4 = inlined_call_operand.hbm [shape: f32[1,8], index: 4, kind: input, shape index: {}]   ;;  %s4412_s5 = inlined_call_operand.hbm [shape: bf16[4,8], index: 5, kind: input, shape index: {}]   ;;  %s4413_s6 = inlined_call_operand.hbm [shape: f32[1,8], index: 6, kind: input, shape index: {}]   ;;  %s4414_s7 = inlined_call_operand.vmem [shape: f32[12,8], index: 7, kind: input, shape index: {}]   ;;  %s4415_s8 = inlined_call_operand.vmem [shape: bf16[3,8,8], index: 8, kind: input, shape index: {}]   ;;  %s4416_s9 = inlined_call_operand.vmem [shape: f32[1,8], index: 9, kind: input, shape index: {}]   ;;  %s4417_s10 = inlined_call_operand.vmem [shape: bf16[3,8,8], index: 10, kind: input, shape index: {}]   ;;  %s4418_s11 = inlined_call_operand.vmem [shape: f32[1,8], index: 11, kind: input, shape index: {}]   ;;  %s4419_s12 = inlined_call_operand.vmem [shape: f32[20,12], index: 12, kind: input, shape index: {}]   ;;  %s4420_s13 = inlined_call_operand.hbm [shape: bf16[3,8,64], index: 13, kind: input, shape index: {}]   ;;  %s4421_s14 = inlined_call_operand.vmem [shape: f32[1,64], index: 14, kind: input, shape index: {}]   ;;  %s4422_s15 = inlined_call_operand.hbm [shape: bf16[64,4096], index: 15, kind: input, shape index: {}]   ;;  %s4423_s16 = inlined_call_operand.vmem [shape: f32[1,4096], index: 16, kind: input, shape index: {}]   ;;  %s4424_s17 = inlined_call_operand.hbm [shape: f32[2,1,4096], index: 17, kind: output, shape index: {}]  }
   0x1   :  { %4436 = sst [smem:[#allocation28_spill]] %s4407_s0 }
   0x2   :  { %4437 = sst [smem:[#allocation29_spill]] %s4408_s1 }
   0x3   :  { %4438 = sst [smem:[#allocation30_spill]] %s4411_s4 }
   0x4   :  { %4439 = sst [smem:[#allocation31_spill]] %s4413_s6 }
   0x5   :  { %4440 = sst [smem:[#allocation32_spill]] %s4424_s17 }
   0x6   :  { %22 = vsyncpa [#allocation4], 0 }
   0x7   :  { %23 = vsyncpa [#allocation7], 0 }
   0x8   :  { %24 = vsyncpa [#allocation10], 0 }
   0x9   :  { %25 = vsyncpa [#allocation13], 0 }
   0xa   :  { %26 = vsyncpa [#allocation5], 0 }
   0xb   :  { %28 = vsyncpa [#allocation5 + $0x1], 0  ;;  %s4009_s24 = smov 0   ;;  %s4011_s25 = smov 0  }
   0xc   :  { %s4013_s26 = smov 0   ;;  %s4015_s27 = smov 0  }
   0xd LB: > { %4441 = sst [smem:[#allocation20_spill]] %s3891_s24  ;;  %s4030_s28 = sadd.s32 4294967295, %s3903_s27   ;;  %s3903_s27 = sphi %s4015_s27, %s4463_s27   ;;  %s3899_s26 = sphi %s4013_s26, %s4466_s26   ;;  %s3895_s25 = sphi %s4011_s25, %s4465_s25   ;;  %s3891_s24 = sphi %s4009_s24, %s4464_s24  }
   0xe   : > { %4442 = sst [smem:[#allocation21_spill]] %s3895_s25  ;;  %s2800_s29 = sadd.s32 4294967294, %s3903_s27  }
   0xf   : > { %4443 = sst [smem:[#allocation22_spill]] %s3899_s26  ;;  %s4034_s0 = sadd.s32 1, %s3903_s27  }
  0x10   : > { %4444 = sst [smem:[#allocation23_spill]] %s3903_s27  ;;  %s403_s30 = sadd.s32 1, %s3899_s26 }
  0x11   : > { %4445 = sst [smem:[#allocation24_spill]] %s4034_s0  ;;  %s400_s18 = ssub.s32 %s3903_s27, %s4034_s0 }
  0x12   : > { %p413_p0 = scmp.ne.s32.totalorder %s3899_s26, %s3895_s25  ;;  %p401_p1 = scmp.eq.s32.totalorder %s400_s18, 0 }
  0x13   : > { %p414_p2 = scmp.eq.s32.totalorder %s4030_s28, 1  ;;  %p419_p3 = scmp.ne.s32.totalorder %s3895_s25, %s3891_s24 }
  0x14   : > { %p420_p4 = scmp.eq.s32.totalorder %s2800_s29, 1  ;;  %p2801_p7 = scmp.ge.s32.totalorder %s3903_s27, 1 }
  0x15   : > { %s4045_s19 = scalar_select %p401_p1, %s3899_s26, %s403_s30  }
  0x16   : > { %p4047_p5 = por %p414_p2, %p413_p0  ;;  %p4051_p6 = por %p420_p4, %p419_p3 }
  0x17   : > { %4446 = sst [smem:[#allocation25_spill]] %s4045_s19  ;;  %p427_p8 = scmp.lt.s32.totalorder %s3903_s27, 3 }
  0x18   : > { %s4447_s1 = scalar_select %p4047_p5, 1, 0 }
  0x19   : > { %s4449_s20 = scalar_select %p4051_p6, 1, 0 }
  0x1a   : > { %4448 = sst [smem:[#allocation26_spill]] %s4447_s1  ;;  %p3580_p9 = scmp.eq.s32.totalorder %s4030_s28, 0 }
  0x1b   : > { %4450 = sst [smem:[#allocation27_spill]] %s4449_s20  ;;  %p4058_p10 = pnand %p2801_p7, %p427_p8 }
  0x1c   : > { %s4452_s4 = sld [smem:[#allocation30_spill]]  ;;  %s3905_s30 = smov [#allocation6]  }
  0x1d   : > { %p3557_p11 = pneg %p4058_p10  ;;  %s461_s18 = sshll.u32 %s3905_s30, 4  ;;  %s462_s18 = int_to_ptr.vmem [resolvable:$true] %s461_s18 }
  0x1e   : > { %s4453_s6 = sld [smem:[#allocation31_spill]]  ;;  %s3906_s27 = smov [#allocation9]  }
  0x1f   : > { %p4072_p12 = pnand %p3580_p9, %p3557_p11  ;;  %s485_s30 = sshll.u32 %s3906_s27, 4  ;;  %s486_s30 = int_to_ptr.vmem [resolvable:$true] %s485_s30 }
  0x20   : > { %s3907_s26 = smov [#allocation3]   ;;  %s471_s17 = sshll.u32 %s4412_s5, 4  ;;  %s472_s17 = int_to_ptr.hbm [resolvable:$true] %s471_s17 }
  0x21   : > { %s440_s19 = sshll.u32 %s3907_s26, 4  ;;  %s3908_s25 = smov 32   ;;  %s441_s19 = int_to_ptr.vmem [resolvable:$true] %s440_s19 }
  0x22   : > { %s459_s29 = sshll.u32 %s4452_s4, 4  ;;  %s4455_s4 = sld [smem:[#allocation29_spill]]  ;;  %s460_s29 = int_to_ptr.hbm [resolvable:$true] %s459_s29 }
  0x23   : > { %3563 = dma.hbm_to_vmem [thread:$0]  (!%p4072_p12), %s460_s29, 16, %s462_s18, [#allocation7]  }
  0x24   : > { %s483_s0 = sshll.u32 %s4453_s6, 4  ;;  %s3909_s22 = smov 2   ;;  %s484_s0 = int_to_ptr.hbm [resolvable:$true] %s483_s0 }
  0x25   : > { %3569 = dma.hbm_to_vmem [thread:$0]  (!%p4072_p12), %s484_s0, 16, %s486_s30, [#allocation10]  }
  0x26   : > { %s512_s23 = sshll.u32 %s4420_s13, 4  ;;  %s3911_s0 = smov [#allocation11]   ;;  %s513_s23 = int_to_ptr.hbm [resolvable:$true] %s512_s23 }
  0x27   : > { %s514_s6 = sshll.u32 %s3911_s0, 4  ;;  %s529_s26 = sshll.u32 %s4422_s15, 4  ;;  %s515_s6 = int_to_ptr.vmem [resolvable:$true] %s514_s6  ;;  %s530_s26 = int_to_ptr.hbm [resolvable:$true] %s529_s26 }
  0x28   : > { %s438_s24 = sshll.u32 %s4455_s4, 4  ;;  %s3910_s4 = smov [#allocation8]   ;;  %s439_s24 = int_to_ptr.hbm [resolvable:$true] %s438_s24 }
  0x29   : > { %3560 = dma.hbm_to_vmem [thread:$0]  (!%p4072_p12), %s439_s24, 96, %s441_s19, [#allocation4], %s3908_s25, %s3908_s25, %s3909_s22  }
  0x2a   : > { %s473_s27 = sshll.u32 %s3910_s4, 4  ;;  %s3912_s24 = smov 64   ;;  %s474_s27 = int_to_ptr.vmem [resolvable:$true] %s473_s27 }
  0x2b   : > { %3566 = dma.hbm_to_vmem [thread:$0]  (!%p4072_p12), %s472_s17, 32, %s474_s27, [#allocation7]  }
  0x2c   : > { %s3913_s25 = smov 4   ;;  %s3914_s19 = smov [#allocation12]  }
  0x2d   : > { %3572 = dma.hbm_to_vmem [thread:$0]  (!%p4072_p12), %s513_s23, 192, %s515_s6, [#allocation10], %s3912_s24, %s3912_s24, %s3913_s25  }
  0x2e   : > { %s531_s22 = sshll.u32 %s3914_s19, 4  ;;  %s3915_s4 = smov 2048   ;;  %s532_s22 = int_to_ptr.vmem [resolvable:$true] %s531_s22 }
  0x2f   : > { %s3916_s29 = smov 128   ;;  %557 = sbr.rel (%p4058_p10) target bundleno = 1297 (0x511), region = 88 }
  0x30   : > { %3575 = dma.hbm_to_vmem [thread:$0]  (!%p4072_p12), %s530_s26, 16384, %s532_s22, [#allocation13], %s3915_s4, %s3915_s4, %s3916_s29  }
  0x34   : > { %3870 = dma.done.wait (%p3580_p9), [#allocation4], 96  }
  0x35   : > { %3872 = vsyncadd (%p3580_p9), [#allocation4], 4294967200 }
  0x36   : > { %3874 = dma.done.wait (%p3580_p9), [#allocation7], 48  }
  0x37   : > { %3876 = vsyncadd (%p3580_p9), [#allocation7], 4294967248 }
  0x38   : > { %3878 = dma.done.wait (%p3580_p9), [#allocation10], 208  }
  0x39   : > { %3880 = vsyncadd (%p3580_p9), [#allocation10], 4294967088 }
  0x3a   : > { %3882 = dma.done.wait (%p3580_p9), [#allocation13], 16384  }
  0x3b   : > { %3884 = vsyncadd (%p3580_p9), [#allocation13], 4294950912  ;;  %p634_p13 = scmp.lt.s32.totalorder %s4030_s28, 1  ;;  %v3917_v0 = vmov 0.0   ;;  %vm667_vm0 = vcmask 1041408   ;;  %s4456_s18 = sld [smem:[#allocation28_spill]] }
  0x3c   : > { %646 = vst [vmem:[#allocation2] sm:$0xff] %v3917_v0  ;;  %vm649_vm1 = vcmask 31744   ;;  %v654_v1 = vld [vmem:[#allocation3] sm:$0x3]  ;;  %v705_v2 = vld [vmem:[#allocation3 + $0x4] sm:$0x3] }
  0x3d   : > { %s635_s17 = scalar_select %p634_p13, %s4030_s28, 1  ;;  %647 = vst [vmem:[#allocation2 + $0x8] sm:$0xff] %v3917_v0  ;;  %v688_v4 = vsel %vm667_vm0, %v654_v1, 0  ;;  %v712_v5 = vsel %vm667_vm0, %v705_v2, 0  ;;  %v656_v6 = vld [vmem:[#allocation3 + $0x2] sm:$0x3] }
  0x3e   : > { %893 = vst [vmem:[#allocation2 + $0x10] sm:$0xff] %v3917_v0  ;;  %697 = vmatpush.bf16.msra.mxu1 %v688_v4  ;;  %721 = vmatpush.bf16.msra.mxu2 %v712_v5  ;;  %v669_v7 = vsel %vm667_vm0, %v656_v6, 0  ;;  %v642_v8 = vld [vmem:[#allocation8] sm:$0x3]  ;;  %vm812_vm2 = vcmask 1043456   ;;  %vm760_vm3 = vcmask 64512  }
  0x3f   : > { %s2817_s20 = sshll.u32 %s635_s17, 3  ;;  %678 = vmatpush.bf16.msra.mxu0 %v669_v7  ;;  %v745_v9 = vsel %vm667_vm0, %v642_v8, 0  ;;  %v799_v19 = vld [vmem:[%s4410_s3] sm:$0xf]  ;;  %v2827_v21 = vld [vmem:[%s4410_s3 + $0x8] sm:$0xf] }
  0x40   : > { %754 = vmatpush.bf16.msra.mxu3 %v745_v9  ;;  %v833_v20 = vsel %vm812_vm2, %v799_v19, 0  ;;  %v857_v22 = vsel %vm812_vm2, %v2827_v21, 0  ;;  %v3640_v23 = vld [vmem:[#allocation9] ss:$0 sm:$0xff]  ;;  %v2824_v25 = vld [vmem:[%s4410_s3 + $0x4] sm:$0xf] }
  0x41   : > { %s637_s23 = scalar_lea.vmem %s4456_s18, %s2817_s20  ;;  %v645_v27 = vld [vmem:[%s4414_s7 + $0x8] sm:$0xf]  ;;  %v814_v29 = vsel %vm812_vm2, %v2824_v25, 0  ;;  %v3639_v32 = vld [vmem:[%s4409_s2] ss:$0 sm:$0xff]  ;;  %vm794_vm4 = vcmask 58368  }
  0x42   : > { %v639_v3 = vld [vmem:[%s637_s23] sm:$0xff]  ;;  %842 = vmatpush.bf16.msrb.mxu2 %v833_v20  ;;  %v2832_v60 = vld [vmem:[%s4415_s8 + $0x8] sm:$0xf]  ;;  %v3641_v2 = vld [vmem:[#allocation6] ss:$0 sm:$0xff]  ;;  %vm895_vm5 = vcmask 60416  }
  0x43   : > { %650 = vst.msk [vmem:[#allocation2 + $0x2] sm:$0xff] %vm649_vm1, %v639_v3  ;;  %v737_v10 = vpack.c.bf16 %v639_v3, %v639_v3  ;;  %v644_v33 = vld [vmem:[%s4414_s7] sm:$0xff]  ;;  %v961_v61 = vsel %vm812_vm2, %v2832_v60, 0  ;;  %vm907_vm6 = vcmask 1046528   ;;  %vm953_vm7 = vcmask 1045504   ;;  %s4457_s26 = sld [smem:[#allocation21_spill]] }
  0x44   : > { %866 = vmatpush.bf16.msrb.mxu3 %v857_v22  ;;  %v901_v55 = vld [vmem:[%s4415_s8] sm:$0xf]  ;;  %v2829_v56 = vld [vmem:[%s4415_s8 + $0x4] sm:$0xf]  ;;  %vm986_vm8 = vcmask 97280   ;;  %vm1408_vm10 = vcmask 162816  }
  0x45   : > { %2821 = vmatmul.msk.bf16.vlgmr.msra.gmra.mxu3 %vm649_vm1, %v737_v10  ;;  %v935_v57 = vsel %vm812_vm2, %v901_v55, 0  ;;  %v915_v58 = vsel %vm812_vm2, %v2829_v56, 0  ;;  %v899_v59 = vld [vmem:[#allocation2 + $0x10] sm:$0xf]  ;;  %vm1294_vm9 = vsmask.f32 7424 }
  0x46   : > { %1027 = vst [vmem:[#allocation2 + $0x10] sm:$0xff] %v3917_v0  ;;  %v902_v20 = vpack.c.bf16 %v899_v59, %v899_v59  ;;  %vm2144_vm11 = vcmask 523264   ;;  %vm2624_vm12 = vcmask 1040384   ;;  %vm2626_vm13 = vcmask 1042434   ;;  %s3399_s27 = sshll.u32 %s4030_s28, 5  ;;  %s4458_s0 = sld [smem:[#allocation32_spill]] }
  0x47   : > { %vm2629_vm14 = vcmask 1044484   ;;  %vm2631_vm15 = vcmask 1046534  }
  0x49   : > { %s631_s24 = sand.u32 1, %s4457_s26  }
  0x4a   : > { %v651_v11 = vld [vmem:[#allocation2] sm:$0xff]  ;;  %v652_v12 = vld [vmem:[#allocation2 + $0x8] sm:$0xf]  ;;  %s2816_s25 = sshll.u32 %s631_s24, 5 }
  0x4b   : > { %v653_v13 = vpack.c.bf16 %v652_v12, %v651_v11  ;;  %790 = vst [vmem:[#allocation2] sm:$0xff] %v3917_v0  ;;  %s4330_s19 = scalar_lea.vmem [#allocation14], %s2816_s25  ;;  %s2666_s25 = scalar_lea.sflag [#allocation5], %s631_s24 }
  0x4c   : > { %791 = vst [vmem:[#allocation2 + $0x8] sm:$0xff] %v3917_v0  ;;  %s2676_s6 = scalar_lea.hbm %s4458_s0, %s3399_s27  ;;  %s2678_s28 = sshll.u32 %s4330_s19, 4  ;;  %s2679_s28 = int_to_ptr.vmem [resolvable:$true] %s2678_s28 }
  0x4d   : > { %2819 = vmatmul.msk.bf16.vlgmr.msra.gmra.mxu1 %vm649_vm1, %v653_v13  ;;  %v707_v14 = vrot.slane %v653_v13, 1  ;;  %v658_v15 = vshrl.u32 %v653_v13, 16  ;;  %v660_v16 = vshll.u32 %v653_v13, 16  ;;  %s2680_s1 = sshll.u32 %s2676_s6, 4  ;;  %s3845_s20 = scalar_lea.hbm %s4458_s0, 64  ;;  %s2681_s1 = int_to_ptr.hbm [resolvable:$true] %s2680_s1 }
  0x4e   : > { %s3839_s22 = sshra.s32 %s2681_s1, 4  ;;  %s3840_s22 = int_to_ptr.hbm [resolvable:$true] %s3839_s22 }
  0x4f   : > { %2820 = vmatmul.msk.bf16.vlgmr.msra.gmra.mxu2 %vm649_vm1, %v707_v14  ;;  %v662_v17 = vrot.slane %v660_v16, 1  ;;  %s3841_s4 = scalar_lea.hbm %s3840_s22, 32  ;;  %p3846_p3 = scmp.lt.s32.totalorder %s3840_s22, %s4458_s0 }
  0x50   : > { %970 = vmatpush.bf16.msra.mxu2 %v961_v61  ;;  %p3842_p0 = scmp.ne.s32.totalorder %s3840_s22, %s3841_s4  ;;  %p3847_p4 = scmp.lt.s32.totalorder %s3845_s20, %s3841_s4 }
  0x51   : > { %v663_v18 = vor.u32 %v662_v17, %v658_v15 }
  0x52   : > { %p3843_p1 = pnand %p3842_p0, %p4047_p5  ;;  %p3848_p7 = por %p3847_p4, %p3846_p3 }
  0x53   : > { %2818 = vmatmul.msk.bf16.vlgmr.msra.gmra.mxu0 %vm649_vm1, %v663_v18  ;;  %vm2633_vm1 = vcmask 1045508  }
  0x54   : > { %p3844_p2 = pneg %p3843_p1 }
  0x56   : > { %p3849_p8 = pnand %p3848_p7, %p3844_p2 }
  0xc8   : > { %v756_v24 = vpop.f32.mrf.mxu3 }
  0xc9   : > { %v757_v26 = vadd.f32 %v3640_v23, %v756_v24  ;;  %v909_v23 = vrot.slane %v902_v20, 1  ;;  %v955_v24 = vrot.slane %v902_v20, 2 }
  0xca   : > { %v699_v28 = vpop.f32.mrf.mxu1 }
  0xcb   : > { %782 = vmatpush.msrb.mxu0 %v757_v26  ;;  %3530 = vmatpush.msrb.mxu1 %v757_v26 }
  0xcc   : > { %2823 = vmatmul.msk.f32.vlgmr.msrb.gmra.mxu1 %vm760_vm3, %v645_v27  ;;  %2822 = vmatmul.msk.f32.vlgmr.msrb.gmra.mxu0 %vm760_vm3, %v644_v33  ;;  %v2843_v33 = vld [vmem:[%s4417_s10 + $0x8] sm:$0xf] }
  0xcd   : > { %823 = vmatpush.bf16.msra.mxu1 %v814_v29  ;;  %924 = vmatpush.bf16.msra.mxu0 %v915_v58  ;;  %v1035_v29 = vld [vmem:[%s4417_s10] sm:$0xf] }
  0xd0   : > { %v680_v30 = vpop.f32.mrf.mxu0  ;;  %v758_v36 = vpop.f32.mrf.mxu3 }
  0xd1   : > { %v700_v31 = vadd.f32 %v699_v28, %v680_v30  ;;  %944 = vmatpush.bf16.msrb.mxu1 %v935_v57  ;;  %v2838_v30 = vld [vmem:[%s4417_s10 + $0x4] sm:$0xf] }
  0xd2   : > { %v723_v34 = vpop.f32.mrf.mxu2  ;;  %v701_v39 = vpop.f32.mrf.mxu1 }
  0xd3   : > { %v728_v35 = vadd.f32 %v723_v34, %v700_v31  ;;  %v1077_v31 = vsel %vm812_vm2, %v1035_v29, 0  ;;  %v1109_v34 = vsel %vm812_vm2, %v2843_v33, 0 }
  0xd5   : > { %v733_v37 = vadd.f32 %v3639_v32, %v728_v35 }
  0xd7   : > { %v735_v38 = vmax.f32 %v733_v37, 0.0  ;;  %v888_v37 = vld [vmem:[%s4419_s12] sm:$0xff] }
  0xd8   : > { %v682_v40 = vpop.f32.mrf.mxu0 }
  0xd9   : > { %793 = vst.msk [vmem:[#allocation2 + $0x2] sm:$0xff] %vm760_vm3, %v735_v38  ;;  %v702_v41 = vadd.f32 %v701_v39, %v682_v40  ;;  %v3642_v39 = vld [vmem:[%s4416_s9] ss:$0 sm:$0xff] }
  0xda   : > { %v725_v42 = vpop.f32.mrf.mxu2 }
  0xdb   : > { %v729_v43 = vadd.f32 %v725_v42, %v702_v41 }
  0xdd   : > { %v734_v44 = vadd.f32 %v3639_v32, %v729_v43  ;;  %v1050_v32 = vsel %vm812_vm2, %v2838_v30, 0 }
  0xde   : > { %1059 = vmatpush.bf16.msrb.mxu0 %v1050_v32 }
  0xdf   : > { %v736_v45 = vmax.f32 %v734_v44, 0.0 }
  0xe0   : > { %v796_v46 = vld [vmem:[#allocation2] sm:$0xff] }
  0xe1   : > { %795 = vst.msk [vmem:[#allocation2 + $0xa] sm:$0x3] %vm794_vm4, %v736_v45 }
  0xe2   : > { %891 = vst [vmem:[#allocation2] sm:$0xff] %v3917_v0 }
  0xe8   : > { %v797_v47 = vld [vmem:[#allocation2 + $0x8] sm:$0x3f] }
  0xe9   : > { %v798_v48 = vpack.c.bf16 %v797_v47, %v796_v46  ;;  %892 = vst [vmem:[#allocation2 + $0x8] sm:$0xff] %v3917_v0 }
  0xeb   : > { %2826 = vmatmul.msk.bf16.vlgmr.msrb.gmra.mxu2 %vm760_vm3, %v798_v48  ;;  %v852_v49 = vrot.slane %v798_v48, 1  ;;  %v805_v50 = vshll.u32 %v798_v48, 16  ;;  %v803_v51 = vshrl.u32 %v798_v48, 16 }
  0xec   : > { %1118 = vmatpush.bf16.msrb.mxu2 %v1109_v34 }
  0xed   : > { %2828 = vmatmul.msk.bf16.vlgmr.msrb.gmra.mxu3 %vm760_vm3, %v852_v49  ;;  %v807_v52 = vrot.slane %v805_v50, 1  ;;  %v889_v49 = vld [vmem:[%s4419_s12 + $0x8] sm:$0xff] }
  0xef   : > { %v808_v53 = vor.u32 %v807_v52, %v803_v51 }
  0xf1   : > { %2825 = vmatmul.msk.bf16.vlgmr.msra.gmra.mxu1 %vm760_vm3, %v808_v53  ;;  %v890_v53 = vld [vmem:[%s4419_s12 + $0x10] sm:$0xf] }
  0xf2   : > { %1086 = vmatpush.bf16.msra.mxu1 %v1077_v31 }
 0x149   : > { %v787_v54 = vpop.f32.mrf.mxu1  ;;  %v784_v6 = vpop.f32.mrf.mxu0 }
 0x16e   : > { %v825_v62 = vpop.f32.mrf.mxu1  ;;  %v844_v63 = vpop.f32.mrf.mxu2 }
 0x16f   : > { %v845_v1 = vadd.f32 %v844_v63, %v825_v62 }
 0x170   : > { %v868_v3 = vpop.f32.mrf.mxu3 }
 0x171   : > { %v873_v4 = vadd.f32 %v868_v3, %v845_v1  ;;  %v1291_v1 = vld [vmem:[#allocation11] sm:$0xf] }
 0x173   : > { %v878_v5 = vadd.f32 %v3641_v2, %v873_v4  ;;  %v1363_v4 = vld [vmem:[#allocation11 + $0x8] sm:$0xf] }
 0x175   : > { %v880_v7 = vmax.f32 %v878_v5, 0.0  ;;  %v1293_v5 = vld [vmem:[#allocation11 + $0x4] sm:$0xf] }
 0x176   : > { %v827_v8 = vpop.f32.mrf.mxu1  ;;  %v846_v9 = vpop.f32.mrf.mxu2 }
 0x177   : > { %v882_v10 = vadd.f32 %v880_v7, %v784_v6  ;;  %v847_v11 = vadd.f32 %v846_v9, %v827_v8  ;;  %v1376_v6 = vsel %vm812_vm2, %v1363_v4, 0  ;;  %v1317_v7 = vsel %vm812_vm2, %v1293_v5, 0  ;;  %v3256_v5 = vld [vmem:[#allocation12 + $0x310] sm:$0xf] }
 0x178   : > { %v870_v12 = vpop.f32.mrf.mxu3 }
 0x179   : > { %v884_v13 = vmax.f32 %v882_v10, 0.0  ;;  %v874_v14 = vadd.f32 %v870_v12, %v847_v11  ;;  %v3643_v10 = vld [vmem:[%s4418_s11] ss:$0 sm:$0xff] }
 0x17b   : > { %894 = vst.msk [vmem:[#allocation2 + $0x4] sm:$0xff] %vm760_vm3, %v884_v13  ;;  %v879_v15 = vadd.f32 %v3641_v2, %v874_v14  ;;  %v1342_v2 = vsel %vm812_vm2, %v1291_v1, 0  ;;  %v3250_v1 = vld [vmem:[#allocation12 + $0x388] sm:$0xf0] }
 0x17d   : > { %v881_v16 = vmax.f32 %v879_v15, 0.0 }
 0x17f   : > { %v883_v17 = vadd.f32 %v881_v16, %v787_v54 }
 0x181   : > { %v885_v18 = vmax.f32 %v883_v17, 0.0 }
 0x182   : > { %v897_v19 = vld [vmem:[#allocation2] sm:$0xff] }
 0x183   : > { %896 = vst.msk [vmem:[#allocation2 + $0xc] sm:$0xf] %vm895_vm5, %v885_v18  ;;  %2834 = vmatpush.msk.msra.mxu3 %vm812_vm2, %v885_v18 }
 0x184   : > { %1025 = vst [vmem:[#allocation2] sm:$0xff] %v3917_v0 }
 0x185   : > { %1014 = vmatpush.msra.mxu3 %v884_v13 }
 0x186   : > { %2835 = vmatmul.msk.f32.vlgmr.msra.gmra.mxu3 %vm986_vm8, %v888_v37 }
 0x187   : > { %1326 = vmatpush.bf16.msrb.mxu3 %v1317_v7  ;;  %v3112_v7 = vld [vmem:[#allocation12 + $0x200] sm:$0xf] }
 0x18a   : > { %v898_v21 = vld [vmem:[#allocation2 + $0x8] sm:$0xff] }
 0x18b   : > { %v900_v22 = vpack.c.bf16 %v898_v21, %v897_v19  ;;  %1026 = vst [vmem:[#allocation2 + $0x8] sm:$0xff] %v3917_v0 }
 0x18d   : > { %2831 = vmatmul.msk.bf16.vlgmr.msrb.gmra.mxu1 %vm760_vm3, %v900_v22  ;;  %v908_v25 = vrot.slane %v900_v22, 1  ;;  %v954_v26 = vrot.slane %v900_v22, 2 }
 0x18e   : > { %2836 = vmatmul.msk.f32.gmra.mxu3 %vm986_vm8, %v889_v49  ;;  %1385 = vmatpush.bf16.msrb.mxu1 %v1376_v6  ;;  %v3516_v6 = vld [vmem:[#allocation12 + $0x38c] sm:$0xf0] }
 0x18f   : > { %v910_v27 = vsel %vm907_vm6, %v908_v25, %v909_v23  ;;  %v956_v28 = vsel %vm953_vm7, %v954_v26, %v955_v24 }
 0x190   : > { %2830 = vmatmul.msk.bf16.vlgmr.msra.gmra.mxu0 %vm760_vm3, %v910_v27  ;;  %2833 = vmatmul.msk.bf16.vlgmr.msra.gmra.mxu2 %vm760_vm3, %v956_v28 }
 0x191   : > { %1351 = vmatpush.bf16.msra.mxu0 %v1342_v2 }
 0x196   : > { %2837 = vmatmul.msk.f32.gmra.mxu3 %vm986_vm8, %v890_v53 }
 0x209   : > { %v1016_v12 = vpop.f32.mrf.mxu3 }
 0x20a   : > { %v946_v36 = vpop.f32.mrf.mxu1 }
 0x20d   : > { %v926_v35 = vpop.f32.mrf.mxu0 }
 0x20e   : > { %v947_v38 = vadd.f32 %v946_v36, %v926_v35 }
 0x211   : > { %v1019_v24 = vpop.f32.mrf.mxu3 }
 0x212   : > { %v948_v45 = vpop.f32.mrf.mxu1 }
 0x213   : > { %v972_v40 = vpop.f32.mrf.mxu2 }
 0x214   : > { %v977_v41 = vadd.f32 %v972_v40, %v947_v38 }
 0x215   : > { %v928_v43 = vpop.f32.mrf.mxu0 }
 0x216   : > { %v982_v42 = vadd.f32 %v3642_v39, %v977_v41  ;;  %v949_v46 = vadd.f32 %v948_v45, %v928_v43 }
 0x218   : > { %v984_v44 = vmax.f32 %v982_v42, 0.0 }
 0x219   : > { %v1022_v35 = vpop.f32.mrf.mxu3 }
 0x21a   : > { %1028 = vst.msk [vmem:[#allocation2 + $0x4] sm:$0xff] %vm760_vm3, %v984_v44 }
 0x21b   : > { %v974_v47 = vpop.f32.mrf.mxu2 }
 0x21c   : > { %v978_v48 = vadd.f32 %v974_v47, %v949_v46 }
 0x21e   : > { %v983_v50 = vadd.f32 %v3642_v39, %v978_v48 }
 0x220   : > { %v985_v51 = vmax.f32 %v983_v50, 0.0 }
 0x221   : > { %v1030_v52 = vld [vmem:[#allocation2] sm:$0xff] }
 0x222   : > { %1029 = vst.msk [vmem:[#allocation2 + $0xc] sm:$0xff] %vm760_vm3, %v985_v51 }
 0x223   : > { %1280 = vst [vmem:[#allocation2] sm:$0xff] %v3917_v0 }
 0x229   : > { %v1031_v54 = vld [vmem:[#allocation2 + $0x8] sm:$0xff]  ;;  %v1032_v55 = vld [vmem:[#allocation2 + $0x10] sm:$0xff] }
 0x22a   : > { %v1033_v56 = vpack.c.bf16 %v1031_v54, %v1030_v52  ;;  %1281 = vst [vmem:[#allocation2 + $0x8] sm:$0xff] %v3917_v0  ;;  %v1034_v57 = vpack.c.bf16 %v1032_v55, %v1032_v55 }
 0x22b   : > { %1282 = vst [vmem:[#allocation2 + $0x10] sm:$0xff] %v3917_v0 }
 0x22c   : > { %2841 = vmatmul.msk.bf16.vlgmr.msra.gmra.mxu1 %vm760_vm3, %v1033_v56  ;;  %v1040_v58 = vrot.slane %v1033_v56, 1  ;;  %v1041_v59 = vrot.slane %v1034_v57, 1  ;;  %v1099_v60 = vrot.slane %v1033_v56, 2  ;;  %v1100_v61 = vrot.slane %v1034_v57, 2 }
 0x22e   : > { %v1042_v62 = vsel %vm907_vm6, %v1040_v58, %v1041_v59  ;;  %v1101_v63 = vsel %vm953_vm7, %v1099_v60, %v1100_v61 }
 0x22f   : > { %2839 = vmatmul.msk.bf16.vlgmr.msrb.gmra.mxu0 %vm760_vm3, %v1042_v62  ;;  %2844 = vmatmul.msk.bf16.vlgmr.msrb.gmra.mxu2 %vm760_vm3, %v1101_v63  ;;  %v3514_v62 = vld [vmem:[#allocation12 + $0x37c] sm:$0xf0] }
 0x23c   : > { %2842 = vmatmul.msk.bf16.gmra.mxu1 %vm760_vm3, %v1034_v57 }
 0x23f   : > { %2840 = vmatmul.msk.bf16.gmra.mxu0 %vm760_vm3, %v1041_v59  ;;  %2845 = vmatmul.msk.bf16.gmra.mxu2 %vm760_vm3, %v1100_v61  ;;  %v3240_v61 = vld [vmem:[#allocation12 + $0x300] sm:$0xf] }
 0x240   : > { %v3241_v63 = vor.u32 %v3514_v62, %v3240_v61  ;;  %v2866_v61 = vld [vmem:[#allocation12 + $0x88] sm:$0xf0] }
 0x242   : > { %2152 = vmatpush.bf16.msra.mxu3 %v3241_v63 }
 0x2a9   : > { %v1088_v0 = vpop.f32.mrf.mxu1 }
 0x2ac   : > { %v1061_v3 = vpop.f32.mrf.mxu0 }
 0x2ad   : > { %v1089_v8 = vadd.f32 %v1088_v0, %v1061_v3  ;;  %v3499_v0 = vld [vmem:[#allocation12 + $0x30c] sm:$0xf] }
 0x2ae   : > { %v3253_v4 = vor.u32 %v3499_v0, %v3250_v1  ;;  %v2872_v0 = vld [vmem:[#allocation12 + $0x10] sm:$0xf] }
 0x2af   : > { %v3420_v1 = vld [vmem:[#allocation12 + $0x8c] sm:$0xf0] }
 0x2b0   : > { %2191 = vmatpush.bf16.msrb.mxu0 %v3253_v4  ;;  %v3515_v4 = vld [vmem:[#allocation12 + $0x384] sm:$0xf0] }
 0x2b1   : > { %v1090_v9 = vpop.f32.mrf.mxu1 }
 0x2b2   : > { %v1120_v11 = vpop.f32.mrf.mxu2 }
 0x2b3   : > { %v1129_v13 = vadd.f32 %v1120_v11, %v1089_v8  ;;  %v3257_v8 = vor.u32 %v3516_v6, %v3256_v5  ;;  %v3467_v11 = vld [vmem:[#allocation12 + $0x20c] sm:$0xf]  ;;  %v3500_v5 = vld [vmem:[#allocation12 + $0x314] sm:$0xf] }
 0x2b4   : > { %v1063_v14 = vpop.f32.mrf.mxu0 }
 0x2b5   : > { %v1135_v15 = vadd.f32 %v3643_v10, %v1129_v13  ;;  %v1091_v17 = vadd.f32 %v1090_v9, %v1063_v14  ;;  %v3482_v9 = vld [vmem:[#allocation12 + $0x27c] sm:$0xf0]  ;;  %2204 = vmatpush.bf16.msra.mxu1 %v3257_v8  ;;  %v3128_v13 = vld [vmem:[#allocation12 + $0x210] sm:$0xf]  ;;  %v3501_v8 = vld [vmem:[#allocation12 + $0x31c] sm:$0xf] }
 0x2b7   : > { %v1138_v16 = vmax.f32 %v1135_v15, 0.0  ;;  %v3484_v15 = vld [vmem:[#allocation12 + $0x28c] sm:$0xf0] }
 0x2b9   : > { %v1141_v18 = vadd.f32 %v1138_v16, %v1016_v12  ;;  %v1093_v19 = vpop.f32.mrf.mxu1  ;;  %v3122_v12 = vld [vmem:[#allocation12 + $0x288] sm:$0xf0]  ;;  %v2984_v16 = vld [vmem:[#allocation12 + $0x100] sm:$0xf] }
 0x2ba   : > { %v1122_v20 = vpop.f32.mrf.mxu2  ;;  %v3125_v14 = vor.u32 %v3467_v11, %v3122_v12  ;;  %v3272_v12 = vld [vmem:[#allocation12 + $0x320] sm:$0xf] }
 0x2bb   : > { %v1144_v21 = vmax.f32 %v1141_v18, 0.0  ;;  %v1130_v22 = vadd.f32 %v1122_v20, %v1091_v17  ;;  %v3450_v17 = vld [vmem:[#allocation12 + $0x17c] sm:$0xf0] }
 0x2bc   : > { %v1066_v23 = vpop.f32.mrf.mxu0  ;;  %v2985_v20 = vor.u32 %v3450_v17, %v2984_v16  ;;  %2192 = vmatpush.bf16.msrb.mxu0 %v3125_v14  ;;  %v3120_v14 = vld [vmem:[#allocation12 + $0x208] sm:$0xf]  ;;  %v3468_v17 = vld [vmem:[#allocation12 + $0x214] sm:$0xf] }
 0x2bd   : > { %1283 = vst.msk [vmem:[#allocation2 + $0x1] sm:$0xff] %vm760_vm3, %v1144_v21  ;;  %v1136_v25 = vadd.f32 %v3643_v10, %v1130_v22  ;;  %v1094_v27 = vadd.f32 %v1093_v19, %v1066_v23  ;;  %v3129_v19 = vor.u32 %v3484_v15, %v3128_v13  ;;  %v3435_v21 = vld [vmem:[#allocation12 + $0x10c] sm:$0xf]  ;;  %v3518_v13 = vld [vmem:[#allocation12 + $0x39c] sm:$0xf0] }
 0x2be   : > { %v2994_v22 = vld [vmem:[#allocation12 + $0x188] sm:$0xf0]  ;;  %v3273_v15 = vor.u32 %v3518_v13, %v3272_v12  ;;  %v3483_v16 = vld [vmem:[#allocation12 + $0x284] sm:$0xf0]  ;;  %v3453_v12 = vld [vmem:[#allocation12 + $0x194] sm:$0xf0] }
 0x2bf   : > { %v1139_v26 = vmax.f32 %v1136_v25, 0.0  ;;  %2205 = vmatpush.bf16.msra.mxu1 %v3129_v19  ;;  %v2997_v25 = vor.u32 %v3435_v21, %v2994_v22  ;;  %v3121_v19 = vor.u32 %v3483_v16, %v3120_v14  ;;  %v3469_v21 = vld [vmem:[#allocation12 + $0x21c] sm:$0xf]  ;;  %v3018_v16 = vld [vmem:[#allocation12 + $0x1a0] sm:$0xf0] }
 0x2c0   : > { %v3138_v22 = vld [vmem:[#allocation12 + $0x298] sm:$0xf0] }
 0x2c1   : > { %v1142_v28 = vadd.f32 %v1139_v26, %v1019_v24  ;;  %v1095_v29 = vpop.f32.mrf.mxu1  ;;  %v3000_v26 = vld [vmem:[#allocation12 + $0x110] sm:$0xf]  ;;  %2193 = vmatpush.bf16.msrb.mxu0 %v2997_v25  ;;  %v3486_v25 = vld [vmem:[#allocation12 + $0x29c] sm:$0xf0] }
 0x2c2   : > { %v1125_v30 = vpop.f32.mrf.mxu2 }
 0x2c3   : > { %v1145_v31 = vmax.f32 %v1142_v28, 0.0  ;;  %v1131_v32 = vadd.f32 %v1125_v30, %v1094_v27  ;;  %v3452_v27 = vld [vmem:[#allocation12 + $0x18c] sm:$0xf0] }
 0x2c4   : > { %v1068_v33 = vpop.f32.mrf.mxu0  ;;  %v1286_v40 = vld [vmem:[#allocation2] sm:$0xff]  ;;  %v3001_v28 = vor.u32 %v3452_v27, %v3000_v26  ;;  %v2992_v26 = vld [vmem:[#allocation12 + $0x108] sm:$0xf] }
 0x2c5   : > { %1284 = vst.msk [vmem:[#allocation2 + $0x9] sm:$0xff] %vm760_vm3, %v1145_v31  ;;  %v1137_v34 = vadd.f32 %v3643_v10, %v1131_v32  ;;  %v3113_v10 = vor.u32 %v3482_v9, %v3112_v7  ;;  %v3258_v7 = vld [vmem:[#allocation12 + $0x390] sm:$0xf0]  ;;  %v3266_v9 = vld [vmem:[#allocation12 + $0x398] sm:$0xf0] }
 0x2c6   : > { %2206 = vmatpush.bf16.msra.mxu1 %v3001_v28  ;;  %v3269_v11 = vor.u32 %v3501_v8, %v3266_v9  ;;  %v3451_v27 = vld [vmem:[#allocation12 + $0x184] sm:$0xf0]  ;;  %v3488_v8 = vld [vmem:[#allocation12 + $0x2ac] sm:$0xf0] }
 0x2c7   : > { %v1140_v36 = vmax.f32 %v1137_v34, 0.0  ;;  %2153 = vmatpush.bf16.msra.mxu3 %v3113_v10  ;;  %v3261_v10 = vor.u32 %v3500_v5, %v3258_v7  ;;  %v3471_v5 = vld [vmem:[#allocation12 + $0x22c] sm:$0xf]  ;;  %v3160_v7 = vld [vmem:[#allocation12 + $0x230] sm:$0xf] }
 0x2c8   : > { %v3161_v14 = vor.u32 %v3488_v8, %v3160_v7  ;;  %v2896_v8 = vld [vmem:[#allocation12 + $0x28] sm:$0xf] }
 0x2c9   : > { %v1143_v37 = vadd.f32 %v1140_v36, %v1022_v35 }
 0x2ca   : > { %v1127_v38 = vpop.f32.mrf.mxu2 }
 0x2cb   : > { %v1146_v39 = vmax.f32 %v1143_v37, 0.0  ;;  %2154 = vmatpush.bf16.msra.mxu3 %v2985_v20  ;;  %v3644_v37 = vld [vmem:[%s4421_s14] ss:$0 sm:$0xff] }
 0x2cc   : > { %v1287_v41 = vld [vmem:[#allocation2 + $0x8] sm:$0xff] }
 0x2cd   : > { %1285 = vst.msk [vmem:[#allocation2 + $0x11] sm:$0xf] %vm895_vm5, %v1146_v39  ;;  %v1289_v42 = vpack.c.bf16 %v1287_v41, %v1286_v40 }
 0x2cf   : > { %2848 = vmatmul.msk.bf16.vlgmr.msra.gmra.mxu0 %vm760_vm3, %v1289_v42  ;;  %v1298_v43 = vshll.u32 %v1289_v42, 16  ;;  %v1366_v47 = vrot.slane %v1289_v42, 1  ;;  %v1296_v49 = vshrl.u32 %v1289_v42, 16 }
 0x2d1   : > { %v1300_v46 = vrot.slane %v1298_v43, 1  ;;  %v3498_v43 = vld [vmem:[#allocation12 + $0x304] sm:$0xf] }
 0x2d3   : > { %v1301_v52 = vor.u32 %v1300_v46, %v1296_v49  ;;  %v3114_v49 = vld [vmem:[#allocation12 + $0x280] sm:$0xf0] }
 0x2d4   : > { %v1288_v44 = vld [vmem:[#allocation2 + $0x10] sm:$0x3f] }
 0x2d5   : > { %v1290_v45 = vpack.c.bf16 %v1288_v44, %v1288_v44  ;;  %v3242_v44 = vld [vmem:[#allocation12 + $0x380] sm:$0xf0] }
 0x2d7   : > { %v1367_v48 = vrot.slane %v1290_v45, 1  ;;  %v1303_v50 = vshll.u32 %v1290_v45, 16  ;;  %v1307_v55 = vshrl.u32 %v1290_v45, 16 }
 0x2d9   : > { %v1368_v51 = vsel %vm907_vm6, %v1366_v47, %v1367_v48  ;;  %v1305_v53 = vrot.slane %v1303_v50, 1  ;;  %v3245_v47 = vor.u32 %v3498_v43, %v3242_v44  ;;  %v3918_v50 = vmov 0.05   ;;  %v3405_v43 = vld [vmem:[#allocation12 + $0x1c] sm:$0xf] }
 0x2da   : > { %2850 = vmatmul.msk.bf16.vlgmr.msrb.gmra.mxu1 %vm760_vm3, %v1368_v51  ;;  %v2882_v44 = vld [vmem:[#allocation12 + $0x98] sm:$0xf0] }
 0x2db   : > { %v1306_v54 = vsel %vm1294_vm9, %v1301_v52, %v1305_v53  ;;  %v1309_v56 = vor.u32 %v1307_v55, %v1305_v53  ;;  %v3434_v52 = vld [vmem:[#allocation12 + $0x104] sm:$0xf]  ;;  %v2856_v55 = vld [vmem:[#allocation12] sm:$0xf] }
 0x2dc   : > { %2846 = vmatmul.msk.bf16.vlgmr.msrb.gmra.mxu3 %vm760_vm3, %v1306_v54  ;;  %v2986_v53 = vld [vmem:[#allocation12 + $0x180] sm:$0xf0] }
 0x2dd   : > { %v2989_v54 = vor.u32 %v3434_v52, %v2986_v53  ;;  %v3517_v52 = vld [vmem:[#allocation12 + $0x394] sm:$0xf0]  ;;  %v3502_v53 = vld [vmem:[#allocation12 + $0x324] sm:$0xf] }
 0x2df   : > { %2849 = vmatmul.msk.bf16.gmra.mxu0 %vm760_vm3, %v1290_v45 }
 0x2ea   : > { %2851 = vmatmul.msk.bf16.gmra.mxu1 %vm760_vm3, %v1367_v48  ;;  %v3466_v48 = vld [vmem:[#allocation12 + $0x204] sm:$0xf] }
 0x2eb   : > { %v3117_v51 = vor.u32 %v3466_v48, %v3114_v49  ;;  %v2885_v49 = vor.u32 %v3405_v43, %v2882_v44  ;;  %v3304_v43 = vld [vmem:[#allocation12 + $0x340] sm:$0xf] }
 0x2ec   : > { %2847 = vmatmul.msk.bf16.gmra.mxu3 %vm760_vm3, %v1309_v56  ;;  %v3418_v56 = vld [vmem:[#allocation12 + $0x7c] sm:$0xf0] }
 0x2ed   : > { %v3522_v44 = vld [vmem:[#allocation12 + $0x3bc] sm:$0xf0] }
 0x34c   : > { %v1353_v57 = vpop.f32.mrf.mxu0 }
 0x354   : > { %v1355_v58 = vpop.f32.mrf.mxu0 }
 0x357   : > { %v1387_v59 = vpop.f32.mrf.mxu1 }
 0x35c   : > { %v1358_v60 = vpop.f32.mrf.mxu0 }
 0x35f   : > { %v1328_v2 = vpop.f32.mrf.mxu3  ;;  %v1389_v3 = vpop.f32.mrf.mxu1 }
 0x360   : > { %v1354_v30 = vadd.f32 %v1353_v57, %v1328_v2  ;;  %v3402_v57 = vld [vmem:[#allocation12 + $0x4] sm:$0xf]  ;;  %v2873_v2 = vor.u32 %v3420_v1, %v2872_v0  ;;  %v3485_v0 = vld [vmem:[#allocation12 + $0x294] sm:$0xf0] }
 0x362   : > { %v1396_v35 = vadd.f32 %v1387_v59, %v1354_v30  ;;  %v2858_v59 = vld [vmem:[#allocation12 + $0x80] sm:$0xf0]  ;;  %2207 = vmatpush.bf16.msra.mxu1 %v2873_v2  ;;  %v3002_v30 = vld [vmem:[#allocation12 + $0x190] sm:$0xf0] }
 0x363   : > { %v2861_v62 = vor.u32 %v3402_v57, %v2858_v59  ;;  %v3288_v57 = vld [vmem:[#allocation12 + $0x330] sm:$0xf] }
 0x364   : > { %v1360_v18 = vpop.f32.mrf.mxu0  ;;  %v1402_v41 = vadd.f32 %v3644_v37, %v1396_v35  ;;  %v3454_v35 = vld [vmem:[#allocation12 + $0x19c] sm:$0xf0] }
 0x365   : > { %v3130_v18 = vld [vmem:[#allocation12 + $0x290] sm:$0xf0] }
 0x366   : > { %v1405_v46 = vmax.f32 %v1402_v41, 0.0  ;;  %v3133_v20 = vor.u32 %v3468_v17, %v3130_v18  ;;  %2256 = vmatpush.bf16.msrb.mxu1 %v3273_v15  ;;  %v3438_v15 = vld [vmem:[#allocation12 + $0x124] sm:$0xf]  ;;  %v3439_v17 = vld [vmem:[#allocation12 + $0x12c] sm:$0xf] }
 0x367   : > { %v1330_v23 = vpop.f32.mrf.mxu3  ;;  %v1392_v24 = vpop.f32.mrf.mxu1  ;;  %v3026_v18 = vld [vmem:[#allocation12 + $0x1a8] sm:$0xf0] }
 0x368   : > { %v1356_v29 = vadd.f32 %v1355_v58, %v1330_v23  ;;  %v2857_v58 = vor.u32 %v3418_v56, %v2856_v55  ;;  %v3144_v23 = vld [vmem:[#allocation12 + $0x220] sm:$0xf]  ;;  %v3503_v55 = vld [vmem:[#allocation12 + $0x32c] sm:$0xf] }
 0x369   : > { %v3145_v28 = vor.u32 %v3486_v25, %v3144_v23  ;;  %v3282_v56 = vld [vmem:[#allocation12 + $0x3a8] sm:$0xf0]  ;;  %v2880_v23 = vld [vmem:[#allocation12 + $0x18] sm:$0xf]  ;;  %v3029_v25 = vor.u32 %v3439_v17, %v3026_v18  ;;  %v3426_v17 = vld [vmem:[#allocation12 + $0xbc] sm:$0xf0] }
 0x36a   : > { %v1397_v33 = vadd.f32 %v1389_v3, %v1356_v29  ;;  %2155 = vmatpush.bf16.msra.mxu3 %v2857_v58  ;;  %v3248_v3 = vld [vmem:[#allocation12 + $0x308] sm:$0xf]  ;;  %v3436_v29 = vld [vmem:[#allocation12 + $0x114] sm:$0xf]  ;;  %v3520_v58 = vld [vmem:[#allocation12 + $0x3ac] sm:$0xf0]  ;;  %v3285_v1 = vor.u32 %v3503_v55, %v3282_v56 }
 0x36b   : > { %v3249_v6 = vor.u32 %v3515_v4, %v3248_v3  ;;  %2257 = vmatpush.bf16.msrb.mxu1 %v3145_v28  ;;  %v3289_v2 = vor.u32 %v3520_v58, %v3288_v57  ;;  %v3470_v3 = vld [vmem:[#allocation12 + $0x224] sm:$0xf]  ;;  %v3176_v55 = vld [vmem:[#allocation12 + $0x240] sm:$0xf] }
 0x36c   : > { %v1403_v39 = vadd.f32 %v3644_v37, %v1397_v33  ;;  %v3010_v33 = vld [vmem:[#allocation12 + $0x198] sm:$0xf0]  ;;  %v3146_v4 = vld [vmem:[#allocation12 + $0x2a0] sm:$0xf0]  ;;  %v3490_v56 = vld [vmem:[#allocation12 + $0x2bc] sm:$0xf0] }
 0x36d   : > { %v2890_v28 = vld [vmem:[#allocation12 + $0xa0] sm:$0xf0] }
 0x36e   : > { %v1406_v45 = vmax.f32 %v1403_v39, 0.0  ;;  %2178 = vmatpush.bf16.msrb.mxu3 %v3249_v6  ;;  %v3419_v39 = vld [vmem:[#allocation12 + $0x84] sm:$0xf0]  ;;  %v3154_v6 = vld [vmem:[#allocation12 + $0x2a8] sm:$0xf0] }
 0x36f   : > { %v1333_v31 = vpop.f32.mrf.mxu3  ;;  %v1394_v32 = vpop.f32.mrf.mxu1  ;;  %v3157_v13 = vor.u32 %v3471_v5, %v3154_v6  ;;  %v3458_v5 = vld [vmem:[#allocation12 + $0x1bc] sm:$0xf0] }
 0x370   : > { %v1359_v34 = vadd.f32 %v1358_v60, %v1333_v31  ;;  %v3403_v60 = vld [vmem:[#allocation12 + $0xc] sm:$0xf]  ;;  %v3437_v31 = vld [vmem:[#allocation12 + $0x11c] sm:$0xf]  ;;  %v2993_v32 = vor.u32 %v3451_v27, %v2992_v26  ;;  %v3406_v27 = vld [vmem:[#allocation12 + $0x24] sm:$0xf] }
 0x371   : > { %v2869_v63 = vor.u32 %v3403_v60, %v2866_v61 }
 0x372   : > { %v1398_v36 = vadd.f32 %v1392_v24, %v1359_v34  ;;  %v3141_v24 = vor.u32 %v3469_v21, %v3138_v22  ;;  %2179 = vmatpush.bf16.msrb.mxu3 %v3121_v19  ;;  %v3016_v34 = vld [vmem:[#allocation12 + $0x120] sm:$0xf]  ;;  %v3032_v19 = vld [vmem:[#allocation12 + $0x130] sm:$0xf]  ;;  %v3021_v22 = vor.u32 %v3438_v15, %v3018_v16  ;;  %v2914_v15 = vld [vmem:[#allocation12 + $0xb8] sm:$0xf0] }
 0x373   : > { %2194 = vmatpush.bf16.msrb.mxu0 %v2869_v63  ;;  %v3017_v41 = vor.u32 %v3454_v35, %v3016_v34  ;;  %v3136_v63 = vld [vmem:[#allocation12 + $0x218] sm:$0xf]  ;;  %v2893_v34 = vor.u32 %v3406_v27, %v2890_v28  ;;  %v3280_v35 = vld [vmem:[#allocation12 + $0x328] sm:$0xf]  ;;  %v2920_v16 = vld [vmem:[#allocation12 + $0x40] sm:$0xf] }
 0x374   : > { %v1404_v38 = vadd.f32 %v3644_v37, %v1398_v36  ;;  %v3005_v36 = vor.u32 %v3436_v29, %v3002_v30  ;;  %v3013_v37 = vor.u32 %v3437_v31, %v3010_v33  ;;  %v3137_v9 = vor.u32 %v3485_v0, %v3136_v63  ;;  %v3407_v29 = vld [vmem:[#allocation12 + $0x2c] sm:$0xf]  ;;  %v2904_v31 = vld [vmem:[#allocation12 + $0x30] sm:$0xf]  ;;  %v3440_v0 = vld [vmem:[#allocation12 + $0x134] sm:$0xf] }
 0x375   : > { %2258 = vmatpush.bf16.msrb.mxu1 %v3017_v41  ;;  %v2898_v30 = vld [vmem:[#allocation12 + $0xa8] sm:$0xf0]  ;;  %v3505_v41 = vld [vmem:[#allocation12 + $0x33c] sm:$0xf]  ;;  %v3177_v63 = vor.u32 %v3490_v56, %v3176_v55  ;;  %v3320_v28 = vld [vmem:[#allocation12 + $0x350] sm:$0xf] }
 0x376   : > { %v1407_v40 = vmax.f32 %v1404_v38, 0.0  ;;  %v2864_v38 = vld [vmem:[#allocation12 + $0x8] sm:$0xf]  ;;  %2180 = vmatpush.bf16.msrb.mxu3 %v2993_v32  ;;  %v3424_v32 = vld [vmem:[#allocation12 + $0xac] sm:$0xf0] }
 0x377   : > { %v1335_v42 = vpop.f32.mrf.mxu3  ;;  %2243 = vmatpush.bf16.msra.mxu0 %v3269_v11  ;;  %v3008_v11 = vld [vmem:[#allocation12 + $0x118] sm:$0xf]  ;;  %v3314_v27 = vld [vmem:[#allocation12 + $0x3c8] sm:$0xf0] }
 0x378   : > { %2852 = vmatpush.msk.msra.mxu2 %vm812_vm2, %v1407_v40  ;;  %v3404_v40 = vld [vmem:[#allocation12 + $0x14] sm:$0xf]  ;;  %v3009_v21 = vor.u32 %v3453_v12, %v3008_v11  ;;  %v2912_v56 = vld [vmem:[#allocation12 + $0x38] sm:$0xf] }
 0x379   : > { %v2874_v42 = vld [vmem:[#allocation12 + $0x90] sm:$0xf0] }
 0x37a   : > { %1429 = vmatpush.msra.mxu2 %v1406_v45  ;;  %v2888_v45 = vld [vmem:[#allocation12 + $0x20] sm:$0xf]  ;;  %v2877_v48 = vor.u32 %v3404_v40, %v2874_v42  ;;  %v3290_v40 = vld [vmem:[#allocation12 + $0x3b0] sm:$0xf0]  ;;  %v3298_v42 = vld [vmem:[#allocation12 + $0x3b8] sm:$0xf0] }
 0x37b   : > { %2244 = vmatpush.bf16.msra.mxu0 %v3141_v24  ;;  %v3421_v24 = vld [vmem:[#allocation12 + $0x94] sm:$0xf0]  ;;  %v3408_v12 = vld [vmem:[#allocation12 + $0x34] sm:$0xf] }
 0x37c   : > { %1430 = vmatpush.msra.mxu2 %v1405_v46  ;;  %v3422_v46 = vld [vmem:[#allocation12 + $0x9c] sm:$0xf0]  ;;  %v2881_v33 = vor.u32 %v3421_v24, %v2880_v23  ;;  %v2921_v23 = vor.u32 %v3426_v17, %v2920_v16  ;;  %v3506_v24 = vld [vmem:[#allocation12 + $0x344] sm:$0xf]  ;;  %v3184_v17 = vld [vmem:[#allocation12 + $0x248] sm:$0xf] }
 0x37d   : > { %2853 = vmatmul.msk.f32.vlgmr.msra.gmra.mxu2 %vm1408_vm10, %v3918_v50  ;;  %v2889_v50 = vor.u32 %v3422_v46, %v2888_v45 }
 0x37e   : > { %2165 = vmatpush.bf16.msrb.mxu2 %v3245_v47  ;;  %v2865_v47 = vor.u32 %v3419_v39, %v2864_v38  ;;  %v2905_v38 = vor.u32 %v3424_v32, %v2904_v31  ;;  %v3504_v39 = vld [vmem:[#allocation12 + $0x334] sm:$0xf]  ;;  %v3168_v32 = vld [vmem:[#allocation12 + $0x238] sm:$0xf] }
 0x37f   : > { %2245 = vmatpush.bf16.msra.mxu0 %v3013_v37  ;;  %2259 = vmatpush.bf16.msrb.mxu1 %v2889_v50  ;;  %v2901_v37 = vor.u32 %v3407_v29, %v2898_v30  ;;  %v3293_v46 = vor.u32 %v3504_v39, %v3290_v40  ;;  %v3305_v50 = vor.u32 %v3522_v44, %v3304_v43  ;;  %v3524_v29 = vld [vmem:[#allocation12 + $0x3cc] sm:$0xf0]  ;;  %v3186_v39 = vld [vmem:[#allocation12 + $0x2c8] sm:$0xf0]  ;;  %v3040_v44 = vld [vmem:[#allocation12 + $0x138] sm:$0xf] }
 0x380   : > { %2181 = vmatpush.bf16.msrb.mxu3 %v2865_v47  ;;  %v3152_v47 = vld [vmem:[#allocation12 + $0x228] sm:$0xf]  ;;  %v3192_v40 = vld [vmem:[#allocation12 + $0x250] sm:$0xf] }
 0x382   : > { %2166 = vmatpush.bf16.msrb.mxu2 %v3117_v51  ;;  %v3264_v51 = vld [vmem:[#allocation12 + $0x318] sm:$0xf] }
 0x383   : > { %2246 = vmatpush.bf16.msra.mxu0 %v2885_v49  ;;  %v3265_v61 = vor.u32 %v3517_v52, %v3264_v51  ;;  %v3301_v49 = vor.u32 %v3505_v41, %v3298_v42  ;;  %v3472_v51 = vld [vmem:[#allocation12 + $0x234] sm:$0xf]  ;;  %v3492_v41 = vld [vmem:[#allocation12 + $0x2cc] sm:$0xf0] }
 0x384   : > { %v3162_v52 = vld [vmem:[#allocation12 + $0x2b0] sm:$0xf0] }
 0x385   : > { %v3165_v58 = vor.u32 %v3472_v51, %v3162_v52  ;;  %v3058_v51 = vld [vmem:[#allocation12 + $0x1c8] sm:$0xf0]  ;;  %v3064_v52 = vld [vmem:[#allocation12 + $0x150] sm:$0xf] }
 0x386   : > { %2167 = vmatpush.bf16.msrb.mxu2 %v2989_v54  ;;  %v3274_v54 = vld [vmem:[#allocation12 + $0x3a0] sm:$0xf0] }
 0x38a   : > { %2168 = vmatpush.bf16.msrb.mxu2 %v2861_v62  ;;  %v3277_v62 = vor.u32 %v3502_v53, %v3274_v54  ;;  %v3473_v53 = vld [vmem:[#allocation12 + $0x23c] sm:$0xf] }
 0x38b   : > { %v3170_v54 = vld [vmem:[#allocation12 + $0x2b8] sm:$0xf0] }
 0x38e   : > { %2217 = vmatpush.bf16.msra.mxu2 %v3261_v10  ;;  %v3149_v10 = vor.u32 %v3470_v3, %v3146_v4  ;;  %v3042_v3 = vld [vmem:[#allocation12 + $0x1b8] sm:$0xf0]  ;;  %v3048_v4 = vld [vmem:[#allocation12 + $0x140] sm:$0xf] }
 0x38f   : > { %v3049_v11 = vor.u32 %v3458_v5, %v3048_v4  ;;  %v3312_v5 = vld [vmem:[#allocation12 + $0x348] sm:$0xf] }
 0x392   : > { %2218 = vmatpush.bf16.msra.mxu2 %v3133_v20  ;;  %v3456_v20 = vld [vmem:[#allocation12 + $0x1ac] sm:$0xf0] }
 0x393   : > { %v3033_v26 = vor.u32 %v3456_v20, %v3032_v19  ;;  %v3296_v20 = vld [vmem:[#allocation12 + $0x338] sm:$0xf] }
 0x396   : > { %2219 = vmatpush.bf16.msra.mxu2 %v3005_v36  ;;  %v3519_v36 = vld [vmem:[#allocation12 + $0x3a4] sm:$0xf0] }
 0x397   : > { %v3281_v45 = vor.u32 %v3519_v36, %v3280_v35  ;;  %v3321_v35 = vor.u32 %v3524_v29, %v3320_v28  ;;  %v3474_v36 = vld [vmem:[#allocation12 + $0x244] sm:$0xf]  ;;  %v3056_v29 = vld [vmem:[#allocation12 + $0x148] sm:$0xf] }
 0x39a   : > { %2220 = vmatpush.bf16.msra.mxu2 %v2877_v48  ;;  %v3487_v48 = vld [vmem:[#allocation12 + $0x2a4] sm:$0xf0] }
 0x39b   : > { %v3153_v57 = vor.u32 %v3487_v48, %v3152_v47  ;;  %v3193_v47 = vor.u32 %v3492_v41, %v3192_v40  ;;  %v3442_v48 = vld [vmem:[#allocation12 + $0x144] sm:$0xf]  ;;  %v2928_v41 = vld [vmem:[#allocation12 + $0x48] sm:$0xf] }
 0x400   : > { %v1432_v59 = vpop.f32.mrf.mxu2 }
 0x401   : > { %v4249_v60 = vpack.c.bf16 %v1432_v59, %v1432_v59  ;;  %v3024_v59 = vld [vmem:[#allocation12 + $0x128] sm:$0xf] }
 0x403   : > { %3366 = vmatmul.msk.bf16.vlgmr.msra.gmra.mxu3 %vm2144_vm11, %v4249_v60  ;;  %3367 = vmatmul.msk.bf16.vlgmr.msrb.gmra.mxu2 %vm2144_vm11, %v4249_v60 }
 0x404   : > { %3369 = vmatmul.msk.bf16.vlgmr.msrb.gmra.mxu0 %vm2144_vm11, %v4249_v60  ;;  %3370 = vmatmul.msk.bf16.vlgmr.msra.gmra.mxu1 %vm2144_vm11, %v4249_v60 }
 0x405   : > { %2230 = vmatpush.bf16.msra.mxu3 %v3265_v61  ;;  %2269 = vmatpush.bf16.msrb.mxu2 %v3277_v62  ;;  %v3455_v61 = vld [vmem:[#allocation12 + $0x1a4] sm:$0xf0]  ;;  %v3173_v62 = vor.u32 %v3473_v53, %v3170_v54  ;;  %v3460_v53 = vld [vmem:[#allocation12 + $0x1cc] sm:$0xf0] }
 0x406   : > { %2295 = vmatpush.bf16.msrb.mxu0 %v3285_v1  ;;  %2308 = vmatpush.bf16.msra.mxu1 %v3289_v2  ;;  %v3034_v1 = vld [vmem:[#allocation12 + $0x1b0] sm:$0xf0]  ;;  %v3441_v2 = vld [vmem:[#allocation12 + $0x13c] sm:$0xf]  ;;  %v3025_v6 = vor.u32 %v3455_v61, %v3024_v59  ;;  %v3065_v59 = vor.u32 %v3460_v53, %v3064_v52  ;;  %v3410_v61 = vld [vmem:[#allocation12 + $0x44] sm:$0xf] }
 0x407   : > { %v3037_v7 = vor.u32 %v3440_v0, %v3034_v1  ;;  %v2930_v0 = vld [vmem:[#allocation12 + $0xc8] sm:$0xf0]  ;;  %v2936_v1 = vld [vmem:[#allocation12 + $0x50] sm:$0xf]  ;;  %v3328_v53 = vld [vmem:[#allocation12 + $0x358] sm:$0xf] }
 0x409   : > { %2231 = vmatpush.bf16.msra.mxu3 %v3137_v9  ;;  %2270 = vmatpush.bf16.msrb.mxu2 %v3149_v10  ;;  %v3423_v9 = vld [vmem:[#allocation12 + $0xa4] sm:$0xf0]  ;;  %v3045_v10 = vor.u32 %v3441_v2, %v3042_v3  ;;  %v3428_v2 = vld [vmem:[#allocation12 + $0xcc] sm:$0xf0] }
 0x40a   : > { %2296 = vmatpush.bf16.msrb.mxu0 %v3157_v13  ;;  %2309 = vmatpush.bf16.msra.mxu1 %v3161_v14  ;;  %v2906_v13 = vld [vmem:[#allocation12 + $0xb0] sm:$0xf0]  ;;  %v3409_v14 = vld [vmem:[#allocation12 + $0x3c] sm:$0xf]  ;;  %v2897_v18 = vor.u32 %v3423_v9, %v2896_v8  ;;  %v2937_v8 = vor.u32 %v3428_v2, %v2936_v1  ;;  %v3200_v2 = vld [vmem:[#allocation12 + $0x258] sm:$0xf] }
 0x40b   : > { %v2909_v19 = vor.u32 %v3408_v12, %v2906_v13  ;;  %v3508_v9 = vld [vmem:[#allocation12 + $0x354] sm:$0xf]  ;;  %v3330_v12 = vld [vmem:[#allocation12 + $0x3d8] sm:$0xf0]  ;;  %v3336_v13 = vld [vmem:[#allocation12 + $0x360] sm:$0xf] }
 0x40d   : > { %2232 = vmatpush.bf16.msra.mxu3 %v3009_v21  ;;  %2271 = vmatpush.bf16.msrb.mxu2 %v3021_v22  ;;  %v3521_v21 = vld [vmem:[#allocation12 + $0x3b4] sm:$0xf0]  ;;  %v2917_v22 = vor.u32 %v3409_v14, %v2914_v15  ;;  %v3526_v14 = vld [vmem:[#allocation12 + $0x3dc] sm:$0xf0] }
 0x40e   : > { %2297 = vmatpush.bf16.msrb.mxu0 %v3029_v25  ;;  %2310 = vmatpush.bf16.msra.mxu1 %v3033_v26  ;;  %v3306_v25 = vld [vmem:[#allocation12 + $0x3c0] sm:$0xf0]  ;;  %v3507_v26 = vld [vmem:[#allocation12 + $0x34c] sm:$0xf]  ;;  %v3297_v30 = vor.u32 %v3521_v21, %v3296_v20  ;;  %v3337_v20 = vor.u32 %v3526_v14, %v3336_v13  ;;  %v3476_v21 = vld [vmem:[#allocation12 + $0x254] sm:$0xf] }
 0x40f   : > { %v3309_v31 = vor.u32 %v3506_v24, %v3306_v25  ;;  %v3202_v24 = vld [vmem:[#allocation12 + $0x2d8] sm:$0xf0]  ;;  %v3208_v25 = vld [vmem:[#allocation12 + $0x260] sm:$0xf]  ;;  %v3072_v14 = vld [vmem:[#allocation12 + $0x158] sm:$0xf] }
 0x411   : > { %2233 = vmatpush.bf16.msra.mxu3 %v2881_v33  ;;  %2272 = vmatpush.bf16.msrb.mxu2 %v2893_v34  ;;  %v3489_v33 = vld [vmem:[#allocation12 + $0x2b4] sm:$0xf0]  ;;  %v3317_v34 = vor.u32 %v3507_v26, %v3314_v27  ;;  %v3494_v26 = vld [vmem:[#allocation12 + $0x2dc] sm:$0xf0] }
 0x412   : > { %2298 = vmatpush.bf16.msrb.mxu0 %v2901_v37  ;;  %2311 = vmatpush.bf16.msra.mxu1 %v2905_v38  ;;  %v3178_v37 = vld [vmem:[#allocation12 + $0x2c0] sm:$0xf0]  ;;  %v3475_v38 = vld [vmem:[#allocation12 + $0x24c] sm:$0xf]  ;;  %v3169_v42 = vor.u32 %v3489_v33, %v3168_v32  ;;  %v3209_v32 = vor.u32 %v3494_v26, %v3208_v25  ;;  %v3444_v33 = vld [vmem:[#allocation12 + $0x154] sm:$0xf] }
 0x413   : > { %3368 = vmatmul.msk.bf16.vlgmr.msrb.gmra.mxu3 %vm2144_vm11, %v4249_v60  ;;  %3371 = vmatmul.msk.bf16.vlgmr.msra.gmra.mxu2 %vm2144_vm11, %v4249_v60  ;;  %v3181_v43 = vor.u32 %v3474_v36, %v3178_v37  ;;  %v3074_v36 = vld [vmem:[#allocation12 + $0x1d8] sm:$0xf0]  ;;  %v3080_v37 = vld [vmem:[#allocation12 + $0x160] sm:$0xf]  ;;  %v2944_v26 = vld [vmem:[#allocation12 + $0x58] sm:$0xf] }
 0x414   : > { %3373 = vmatmul.msk.bf16.vlgmr.msra.gmra.mxu0 %vm2144_vm11, %v4249_v60  ;;  %3374 = vmatmul.msk.bf16.vlgmr.msrb.gmra.mxu1 %vm2144_vm11, %v4249_v60 }
 0x415   : > { %2282 = vmatpush.bf16.msrb.mxu3 %v3281_v45  ;;  %2321 = vmatpush.bf16.msra.mxu2 %v3293_v46  ;;  %v3457_v45 = vld [vmem:[#allocation12 + $0x1b4] sm:$0xf0]  ;;  %v3189_v46 = vor.u32 %v3475_v38, %v3186_v39  ;;  %v3462_v38 = vld [vmem:[#allocation12 + $0x1dc] sm:$0xf0] }
 0x416   : > { %2347 = vmatpush.bf16.msra.mxu0 %v3301_v49  ;;  %2360 = vmatpush.bf16.msrb.mxu1 %v3305_v50  ;;  %v3050_v49 = vld [vmem:[#allocation12 + $0x1c0] sm:$0xf0]  ;;  %v3443_v50 = vld [vmem:[#allocation12 + $0x14c] sm:$0xf]  ;;  %v3041_v54 = vor.u32 %v3457_v45, %v3040_v44  ;;  %v3081_v44 = vor.u32 %v3462_v38, %v3080_v37  ;;  %v3412_v45 = vld [vmem:[#allocation12 + $0x54] sm:$0xf] }
 0x417   : > { %v3053_v55 = vor.u32 %v3442_v48, %v3050_v49  ;;  %v2946_v48 = vld [vmem:[#allocation12 + $0xd8] sm:$0xf0]  ;;  %v2952_v49 = vld [vmem:[#allocation12 + $0x60] sm:$0xf]  ;;  %v3344_v38 = vld [vmem:[#allocation12 + $0x368] sm:$0xf] }
 0x419   : > { %2283 = vmatpush.bf16.msrb.mxu3 %v3153_v57  ;;  %2322 = vmatpush.bf16.msra.mxu2 %v3165_v58  ;;  %v3425_v57 = vld [vmem:[#allocation12 + $0xb4] sm:$0xf0]  ;;  %v3061_v58 = vor.u32 %v3443_v50, %v3058_v51  ;;  %v3430_v50 = vld [vmem:[#allocation12 + $0xdc] sm:$0xf0] }
 0x41a   : > { %2348 = vmatpush.bf16.msra.mxu0 %v3173_v62  ;;  %2361 = vmatpush.bf16.msrb.mxu1 %v3177_v63  ;;  %v2922_v62 = vld [vmem:[#allocation12 + $0xc0] sm:$0xf0]  ;;  %v3411_v63 = vld [vmem:[#allocation12 + $0x4c] sm:$0xf]  ;;  %v2913_v3 = vor.u32 %v3425_v57, %v2912_v56  ;;  %v2953_v56 = vor.u32 %v3430_v50, %v2952_v49  ;;  %v3495_v50 = vld [vmem:[#allocation12 + $0x2e4] sm:$0xf0] }
 0x41b   : > { %v2925_v4 = vor.u32 %v3410_v61, %v2922_v62  ;;  %v3510_v57 = vld [vmem:[#allocation12 + $0x364] sm:$0xf]  ;;  %v3346_v61 = vld [vmem:[#allocation12 + $0x3e8] sm:$0xf0]  ;;  %v3352_v62 = vld [vmem:[#allocation12 + $0x370] sm:$0xf] }
 0x41d   : > { %2284 = vmatpush.bf16.msrb.mxu3 %v3025_v6  ;;  %2323 = vmatpush.bf16.msra.mxu2 %v3037_v7  ;;  %v3523_v6 = vld [vmem:[#allocation12 + $0x3c4] sm:$0xf0]  ;;  %v2933_v7 = vor.u32 %v3411_v63, %v2930_v0  ;;  %v3528_v63 = vld [vmem:[#allocation12 + $0x3ec] sm:$0xf0] }
 0x41e   : > { %2349 = vmatpush.bf16.msra.mxu0 %v3045_v10  ;;  %2362 = vmatpush.bf16.msrb.mxu1 %v3049_v11  ;;  %v3322_v10 = vld [vmem:[#allocation12 + $0x3d0] sm:$0xf0]  ;;  %v3509_v11 = vld [vmem:[#allocation12 + $0x35c] sm:$0xf]  ;;  %v3313_v15 = vor.u32 %v3523_v6, %v3312_v5  ;;  %v3353_v5 = vor.u32 %v3528_v63, %v3352_v62  ;;  %v3478_v6 = vld [vmem:[#allocation12 + $0x264] sm:$0xf] }
 0x41f   : > { %v3325_v16 = vor.u32 %v3508_v9, %v3322_v10  ;;  %v3218_v9 = vld [vmem:[#allocation12 + $0x2e8] sm:$0xf0]  ;;  %v3224_v10 = vld [vmem:[#allocation12 + $0x270] sm:$0xf]  ;;  %v3098_v62 = vld [vmem:[#allocation12 + $0x1f0] sm:$0xf0] }
 0x420   : > { %v3449_v63 = vld [vmem:[#allocation12 + $0x17c] sm:$0xf] }
 0x421   : > { %2285 = vmatpush.bf16.msrb.mxu3 %v2897_v18  ;;  %2324 = vmatpush.bf16.msra.mxu2 %v2909_v19  ;;  %v3491_v18 = vld [vmem:[#allocation12 + $0x2c4] sm:$0xf0]  ;;  %v3333_v19 = vor.u32 %v3509_v11, %v3330_v12  ;;  %v3496_v11 = vld [vmem:[#allocation12 + $0x2ec] sm:$0xf0] }
 0x422   : > { %2350 = vmatpush.bf16.msra.mxu0 %v2917_v22  ;;  %2363 = vmatpush.bf16.msrb.mxu1 %v2921_v23  ;;  %v3194_v22 = vld [vmem:[#allocation12 + $0x2d0] sm:$0xf0]  ;;  %v3477_v23 = vld [vmem:[#allocation12 + $0x25c] sm:$0xf]  ;;  %v3185_v27 = vor.u32 %v3491_v18, %v3184_v17  ;;  %v3225_v17 = vor.u32 %v3496_v11, %v3224_v10  ;;  %v3446_v18 = vld [vmem:[#allocation12 + $0x164] sm:$0xf] }
 0x423   : > { %3372 = vmatmul.msk.bf16.vlgmr.msra.gmra.mxu3 %vm2144_vm11, %v4249_v60  ;;  %3375 = vmatmul.msk.bf16.vlgmr.msrb.gmra.mxu2 %vm2144_vm11, %v4249_v60  ;;  %v3197_v28 = vor.u32 %v3476_v21, %v3194_v22  ;;  %v3090_v21 = vld [vmem:[#allocation12 + $0x1e8] sm:$0xf0]  ;;  %v3096_v22 = vld [vmem:[#allocation12 + $0x170] sm:$0xf] }
 0x424   : > { %3377 = vmatmul.msk.bf16.vlgmr.msrb.gmra.mxu0 %vm2144_vm11, %v4249_v60  ;;  %3378 = vmatmul.msk.bf16.vlgmr.msra.gmra.mxu1 %vm2144_vm11, %v4249_v60 }
 0x425   : > { %2334 = vmatpush.bf16.msra.mxu3 %v3297_v30  ;;  %2373 = vmatpush.bf16.msrb.mxu2 %v3309_v31  ;;  %v3459_v30 = vld [vmem:[#allocation12 + $0x1c4] sm:$0xf0]  ;;  %v3205_v31 = vor.u32 %v3477_v23, %v3202_v24  ;;  %v3464_v23 = vld [vmem:[#allocation12 + $0x1ec] sm:$0xf0] }
 0x426   : > { %2399 = vmatpush.bf16.msrb.mxu0 %v3317_v34  ;;  %2412 = vmatpush.bf16.msra.mxu1 %v3321_v35  ;;  %v3066_v34 = vld [vmem:[#allocation12 + $0x1d0] sm:$0xf0]  ;;  %v3445_v35 = vld [vmem:[#allocation12 + $0x15c] sm:$0xf]  ;;  %v3057_v39 = vor.u32 %v3459_v30, %v3056_v29  ;;  %v3097_v29 = vor.u32 %v3464_v23, %v3096_v22  ;;  %v3414_v30 = vld [vmem:[#allocation12 + $0x64] sm:$0xf] }
 0x427   : > { %v3069_v40 = vor.u32 %v3444_v33, %v3066_v34  ;;  %v2962_v33 = vld [vmem:[#allocation12 + $0xe8] sm:$0xf0]  ;;  %v2968_v34 = vld [vmem:[#allocation12 + $0x70] sm:$0xf]  ;;  %v2976_v22 = vld [vmem:[#allocation12 + $0x78] sm:$0xf] }
 0x428   : > { %v3433_v23 = vld [vmem:[#allocation12 + $0xf4] sm:$0xf0] }
 0x429   : > { %2335 = vmatpush.bf16.msra.mxu3 %v3169_v42  ;;  %2374 = vmatpush.bf16.msrb.mxu2 %v3181_v43  ;;  %v3427_v42 = vld [vmem:[#allocation12 + $0xc4] sm:$0xf0]  ;;  %v3077_v43 = vor.u32 %v3445_v35, %v3074_v36  ;;  %v3432_v35 = vld [vmem:[#allocation12 + $0xec] sm:$0xf0] }
 0x42a   : > { %2400 = vmatpush.bf16.msrb.mxu0 %v3189_v46  ;;  %2413 = vmatpush.bf16.msra.mxu1 %v3193_v47  ;;  %v2938_v46 = vld [vmem:[#allocation12 + $0xd0] sm:$0xf0]  ;;  %v3413_v47 = vld [vmem:[#allocation12 + $0x5c] sm:$0xf]  ;;  %v2929_v51 = vor.u32 %v3427_v42, %v2928_v41  ;;  %v3527_v41 = vld [vmem:[#allocation12 + $0x3e4] sm:$0xf0] }
 0x42b   : > { %v2941_v52 = vor.u32 %v3412_v45, %v2938_v46  ;;  %v3512_v42 = vld [vmem:[#allocation12 + $0x374] sm:$0xf]  ;;  %v3362_v45 = vld [vmem:[#allocation12 + $0x3f8] sm:$0xf0]  ;;  %v3345_v46 = vor.u32 %v3527_v41, %v3344_v38 }
 0x42d   : > { %2336 = vmatpush.bf16.msra.mxu3 %v3041_v54  ;;  %2375 = vmatpush.bf16.msrb.mxu2 %v3053_v55  ;;  %v3525_v54 = vld [vmem:[#allocation12 + $0x3d4] sm:$0xf0]  ;;  %v2949_v55 = vor.u32 %v3413_v47, %v2946_v48  ;;  %v3216_v48 = vld [vmem:[#allocation12 + $0x268] sm:$0xf] }
 0x42e   : > { %2401 = vmatpush.bf16.msrb.mxu0 %v3061_v58  ;;  %2414 = vmatpush.bf16.msra.mxu1 %v3065_v59  ;;  %v3338_v58 = vld [vmem:[#allocation12 + $0x3e0] sm:$0xf0]  ;;  %v3511_v59 = vld [vmem:[#allocation12 + $0x36c] sm:$0xf]  ;;  %v3329_v0 = vor.u32 %v3525_v54, %v3328_v53  ;;  %v3481_v53 = vld [vmem:[#allocation12 + $0x27c] sm:$0xf] }
 0x42f   : > { %v3341_v1 = vor.u32 %v3510_v57, %v3338_v58  ;;  %v3234_v54 = vld [vmem:[#allocation12 + $0x2f8] sm:$0xf0]  ;;  %v3088_v57 = vld [vmem:[#allocation12 + $0x168] sm:$0xf] }
 0x430   : > { %v3237_v58 = vor.u32 %v3481_v53, %v3234_v54 }
 0x431   : > { %2337 = vmatpush.bf16.msra.mxu3 %v2913_v3  ;;  %2376 = vmatpush.bf16.msrb.mxu2 %v2925_v4  ;;  %v3493_v3 = vld [vmem:[#allocation12 + $0x2d4] sm:$0xf0]  ;;  %v3349_v4 = vor.u32 %v3511_v59, %v3346_v61  ;;  %v3463_v59 = vld [vmem:[#allocation12 + $0x1e4] sm:$0xf0]  ;;  %v3448_v61 = vld [vmem:[#allocation12 + $0x174] sm:$0xf] }
 0x432   : > { %2402 = vmatpush.bf16.msrb.mxu0 %v2933_v7  ;;  %2415 = vmatpush.bf16.msra.mxu1 %v2937_v8  ;;  %v3210_v7 = vld [vmem:[#allocation12 + $0x2e0] sm:$0xf0]  ;;  %v3479_v8 = vld [vmem:[#allocation12 + $0x26c] sm:$0xf]  ;;  %v3201_v12 = vor.u32 %v3493_v3, %v3200_v2  ;;  %v3101_v2 = vor.u32 %v3448_v61, %v3098_v62  ;;  %v2960_v3 = vld [vmem:[#allocation12 + $0x68] sm:$0xf] }
 0x433   : > { %3376 = vmatmul.msk.bf16.vlgmr.msrb.gmra.mxu3 %vm2144_vm11, %v4249_v60  ;;  %3379 = vmatmul.msk.bf16.vlgmr.msra.gmra.mxu2 %vm2144_vm11, %v4249_v60  ;;  %v3213_v13 = vor.u32 %v3478_v6, %v3210_v7  ;;  %v3416_v6 = vld [vmem:[#allocation12 + $0x74] sm:$0xf] }
 0x434   : > { %3381 = vmatmul.msk.bf16.vlgmr.msra.gmra.mxu0 %vm2144_vm11, %v4249_v60  ;;  %3382 = vmatmul.msk.bf16.vlgmr.msrb.gmra.mxu1 %vm2144_vm11, %v4249_v60  ;;  %v2970_v7 = vld [vmem:[#allocation12 + $0xf0] sm:$0xf0] }
 0x435   : > { %2386 = vmatpush.bf16.msrb.mxu3 %v3313_v15  ;;  %2425 = vmatpush.bf16.msra.mxu2 %v3325_v16  ;;  %v3461_v15 = vld [vmem:[#allocation12 + $0x1d4] sm:$0xf0]  ;;  %v3221_v16 = vor.u32 %v3479_v8, %v3218_v9  ;;  %v3417_v8 = vld [vmem:[#allocation12 + $0x7c] sm:$0xf]  ;;  %v2973_v11 = vor.u32 %v3416_v6, %v2970_v7 }
 0x436   : > { %2451 = vmatpush.bf16.msra.mxu0 %v3333_v19  ;;  %2464 = vmatpush.bf16.msrb.mxu1 %v3337_v20  ;;  %v3082_v19 = vld [vmem:[#allocation12 + $0x1e0] sm:$0xf0]  ;;  %v3447_v20 = vld [vmem:[#allocation12 + $0x16c] sm:$0xf]  ;;  %v3073_v24 = vor.u32 %v3461_v15, %v3072_v14  ;;  %v2978_v9 = vld [vmem:[#allocation12 + $0xf8] sm:$0xf0] }
 0x437   : > { %v3085_v25 = vor.u32 %v3446_v18, %v3082_v19  ;;  %v3529_v14 = vld [vmem:[#allocation12 + $0x3f4] sm:$0xf0] }
 0x438   : > { %v3104_v19 = vld [vmem:[#allocation12 + $0x178] sm:$0xf] }
 0x439   : > { %2387 = vmatpush.bf16.msrb.mxu3 %v3185_v27  ;;  %2426 = vmatpush.bf16.msra.mxu2 %v3197_v28  ;;  %v3429_v27 = vld [vmem:[#allocation12 + $0xd4] sm:$0xf0]  ;;  %v3093_v28 = vor.u32 %v3447_v20, %v3090_v21 }
 0x43a   : > { %2452 = vmatpush.bf16.msra.mxu0 %v3205_v31  ;;  %2465 = vmatpush.bf16.msrb.mxu1 %v3209_v32  ;;  %v2954_v31 = vld [vmem:[#allocation12 + $0xe0] sm:$0xf0]  ;;  %v3415_v32 = vld [vmem:[#allocation12 + $0x6c] sm:$0xf]  ;;  %v2945_v36 = vor.u32 %v3429_v27, %v2944_v26  ;;  %v3465_v20 = vld [vmem:[#allocation12 + $0x1f4] sm:$0xf0] }
 0x43b   : > { %v2957_v37 = vor.u32 %v3414_v30, %v2954_v31  ;;  %v3105_v21 = vor.u32 %v3465_v20, %v3104_v19 }
 0x43d   : > { %2388 = vmatpush.bf16.msrb.mxu3 %v3057_v39  ;;  %2427 = vmatpush.bf16.msra.mxu2 %v3069_v40  ;;  %v2965_v39 = vor.u32 %v3415_v32, %v2962_v33  ;;  %v2969_v40 = vor.u32 %v3432_v35, %v2968_v34 }
 0x43e   : > { %2453 = vmatpush.bf16.msra.mxu0 %v3077_v43  ;;  %2466 = vmatpush.bf16.msrb.mxu1 %v3081_v44  ;;  %v3354_v43 = vld [vmem:[#allocation12 + $0x3f0] sm:$0xf0]  ;;  %v3513_v44 = vld [vmem:[#allocation12 + $0x37c] sm:$0xf] }
 0x43f   : > { %v3357_v47 = vor.u32 %v3512_v42, %v3354_v43  ;;  %v3365_v49 = vor.u32 %v3513_v44, %v3362_v45 }
 0x441   : > { %2389 = vmatpush.bf16.msrb.mxu3 %v2929_v51  ;;  %2428 = vmatpush.bf16.msra.mxu2 %v2941_v52  ;;  %v3480_v51 = vld [vmem:[#allocation12 + $0x274] sm:$0xf] }
 0x442   : > { %2454 = vmatpush.bf16.msra.mxu0 %v2949_v55  ;;  %2467 = vmatpush.bf16.msrb.mxu1 %v2953_v56  ;;  %v3226_v52 = vld [vmem:[#allocation12 + $0x2f0] sm:$0xf0]  ;;  %v3217_v55 = vor.u32 %v3495_v50, %v3216_v48 }
 0x443   : > { %3380 = vmatmul.msk.bf16.vlgmr.msra.gmra.mxu3 %vm2144_vm11, %v4249_v60  ;;  %3383 = vmatmul.msk.bf16.vlgmr.msrb.gmra.mxu2 %vm2144_vm11, %v4249_v60  ;;  %v3229_v56 = vor.u32 %v3480_v51, %v3226_v52 }
 0x444   : > { %3385 = vmatmul.msk.bf16.vlgmr.msrb.gmra.mxu0 %vm2144_vm11, %v4249_v60  ;;  %3386 = vmatmul.msk.bf16.vlgmr.msra.gmra.mxu1 %vm2144_vm11, %v4249_v60 }
 0x445   : > { %2438 = vmatpush.bf16.msra.mxu3 %v3329_v0  ;;  %2477 = vmatpush.bf16.msrb.mxu2 %v3341_v1  ;;  %v3106_v0 = vld [vmem:[#allocation12 + $0x1f8] sm:$0xf0]  ;;  %v3089_v1 = vor.u32 %v3463_v59, %v3088_v57 }
 0x446   : > { %2503 = vmatpush.bf16.msrb.mxu0 %v3349_v4  ;;  %2516 = vmatpush.bf16.msra.mxu1 %v3353_v5  ;;  %v3109_v4 = vor.u32 %v3449_v63, %v3106_v0  ;;  %v3431_v5 = vld [vmem:[#allocation12 + $0xe4] sm:$0xf0] }
 0x447   : > { %v2961_v10 = vor.u32 %v3431_v5, %v2960_v3 }
 0x449   : > { %2439 = vmatpush.bf16.msra.mxu3 %v3201_v12  ;;  %2478 = vmatpush.bf16.msrb.mxu2 %v3213_v13  ;;  %v2981_v12 = vor.u32 %v3417_v8, %v2978_v9  ;;  %v3360_v13 = vld [vmem:[#allocation12 + $0x378] sm:$0xf] }
 0x44a   : > { %2504 = vmatpush.bf16.msrb.mxu0 %v3221_v16  ;;  %2517 = vmatpush.bf16.msra.mxu1 %v3225_v17  ;;  %v3361_v15 = vor.u32 %v3529_v14, %v3360_v13  ;;  %v3232_v16 = vld [vmem:[#allocation12 + $0x278] sm:$0xf] }
 0x44b   : > { %v3497_v17 = vld [vmem:[#allocation12 + $0x2f4] sm:$0xf0] }
 0x44c   : > { %v3233_v18 = vor.u32 %v3497_v17, %v3232_v16 }
 0x44d   : > { %2440 = vmatpush.bf16.msra.mxu3 %v3073_v24  ;;  %2479 = vmatpush.bf16.msrb.mxu2 %v3085_v25  ;;  %v2977_v24 = vor.u32 %v3433_v23, %v2976_v22  ;;  %v1277_v22 = vld [vmem:[%s4423_s16 + $0x8] sm:$0xff] }
 0x44e   : > { %2505 = vmatpush.bf16.msrb.mxu0 %v3093_v28  ;;  %2518 = vmatpush.bf16.msra.mxu1 %v3097_v29  ;;  %v2090_v23 = vperm.slane %v1277_v22, 2 }
 0x451   : > { %2441 = vmatpush.bf16.msra.mxu3 %v2945_v36  ;;  %2480 = vmatpush.bf16.msrb.mxu2 %v2957_v37 }
 0x452   : > { %2506 = vmatpush.bf16.msrb.mxu0 %v2965_v39  ;;  %2519 = vmatpush.bf16.msra.mxu1 %v2969_v40  ;;  %v1276_v39 = vld [vmem:[%s4423_s16] sm:$0xff] }
 0x453   : > { %3384 = vmatmul.msk.bf16.vlgmr.msrb.gmra.mxu3 %vm2144_vm11, %v4249_v60  ;;  %3387 = vmatmul.msk.bf16.vlgmr.msra.gmra.mxu2 %vm2144_vm11, %v4249_v60  ;;  %v2082_v40 = vperm.slane %v1276_v39, 2  ;;  %v2083_v42 = vperm.slane %v1276_v39, 3  ;;  %v2081_v43 = vperm.slane %v1276_v39, 1  ;;  %v2085_v44 = vperm.slane %v1276_v39, 5 }
 0x454   : > { %3389 = vmatmul.msk.bf16.vlgmr.msra.gmra.mxu0 %vm2144_vm11, %v4249_v60  ;;  %3390 = vmatmul.msk.bf16.vlgmr.msrb.gmra.mxu1 %vm2144_vm11, %v4249_v60  ;;  %v2084_v45 = vperm.slane %v1276_v39, 4  ;;  %v2086_v53 = vperm.slane %v1276_v39, 6 }
 0x455   : > { %2490 = vmatpush.bf16.msrb.mxu3 %v3345_v46  ;;  %2529 = vmatpush.bf16.msra.mxu2 %v3357_v47  ;;  %v2087_v46 = vperm.slane %v1276_v39, 7 }
 0x456   : > { %2555 = vmatpush.bf16.msra.mxu0 %v3365_v49 }
 0x459   : > { %2491 = vmatpush.bf16.msrb.mxu3 %v3217_v55  ;;  %2530 = vmatpush.bf16.msra.mxu2 %v3229_v56  ;;  %v2080_v55 = vperm.slane %v1276_v39, 0  ;;  %v2088_v39 = vperm.slane %v1277_v22, 0 }
 0x45a   : > { %2556 = vmatpush.bf16.msra.mxu0 %v3237_v58 }
 0x45d   : > { %2492 = vmatpush.bf16.msrb.mxu3 %v3089_v1  ;;  %2531 = vmatpush.bf16.msra.mxu2 %v3101_v2 }
 0x45e   : > { %2557 = vmatpush.bf16.msra.mxu0 %v3109_v4 }
 0x461   : > { %2493 = vmatpush.bf16.msrb.mxu3 %v2961_v10  ;;  %2532 = vmatpush.bf16.msra.mxu2 %v2973_v11 }
 0x462   : > { %2558 = vmatpush.bf16.msra.mxu0 %v2981_v12 }
 0x463   : > { %3388 = vmatmul.msk.bf16.vlgmr.msra.gmra.mxu3 %vm2144_vm11, %v4249_v60  ;;  %3391 = vmatmul.msk.bf16.vlgmr.msrb.gmra.mxu2 %vm2144_vm11, %v4249_v60 }
 0x464   : > { %3393 = vmatmul.msk.bf16.vlgmr.msrb.gmra.mxu0 %vm2144_vm11, %v4249_v60  ;;  %3394 = vmatmul.msk.bf16.vlgmr.msra.gmra.mxu1 %vm2144_vm11, %v4249_v60 }
 0x465   : > { %2542 = vmatpush.bf16.msra.mxu3 %v3361_v15 }
 0x469   : > { %2543 = vmatpush.bf16.msra.mxu3 %v3233_v18 }
 0x46d   : > { %2544 = vmatpush.bf16.msra.mxu3 %v3105_v21 }
 0x471   : > { %2545 = vmatpush.bf16.msra.mxu3 %v2977_v24 }
 0x473   : > { %3392 = vmatmul.msk.bf16.vlgmr.msrb.gmra.mxu3 %vm2144_vm11, %v4249_v60  ;;  %3395 = vmatmul.msk.bf16.vlgmr.msra.gmra.mxu2 %vm2144_vm11, %v4249_v60 }
 0x474   : > { %3397 = vmatmul.msk.bf16.vlgmr.msra.gmra.mxu0 %vm2144_vm11, %v4249_v60 }
 0x481   : > { %v2196_v25 = vpop.f32.mrf.mxu0  ;;  %v2209_v26 = vpop.f32.mrf.mxu1 }
 0x482   : > { %v2197_v50 = vadd.f32 %v2196_v25, %v2083_v42  ;;  %v2210_v54 = vadd.f32 %v2209_v26, %v2084_v45  ;;  %v2091_v26 = vperm.slane %v1277_v22, 3 }
 0x483   : > { %3396 = vmatmul.msk.bf16.vlgmr.msra.gmra.mxu3 %vm2144_vm11, %v4249_v60 }
 0x484   : > { %v2598_v61 = vrot.slane %v2197_v50, 5  ;;  %v2599_v1 = vrot.slane %v2210_v54, 4 }
 0x486   : > { %v2157_v27 = vpop.f32.mrf.mxu3  ;;  %v2170_v28 = vpop.f32.mrf.mxu2 }
 0x487   : > { %v2171_v51 = vadd.f32 %v2170_v28, %v2081_v43  ;;  %v2158_v2 = vadd.f32 %v2157_v27, %v2080_v55  ;;  %v2089_v27 = vperm.slane %v1277_v22, 1  ;;  %v2093_v28 = vperm.slane %v1277_v22, 5 }
 0x489   : > { %v2198_v29 = vpop.f32.mrf.mxu0  ;;  %v2211_v30 = vpop.f32.mrf.mxu1  ;;  %v2596_v62 = vrot.slane %v2171_v51, 7 }
 0x48a   : > { %v2092_v29 = vperm.slane %v1277_v22, 4  ;;  %v2095_v30 = vperm.slane %v1277_v22, 7 }
 0x48b   : > { %v2625_v8 = vsel %vm2624_vm12, %v2158_v2, %v2596_v62 }
 0x48e   : > { %v2159_v31 = vpop.f32.mrf.mxu3  ;;  %v2172_v32 = vpop.f32.mrf.mxu2 }
 0x491   : > { %v2248_v33 = vpop.f32.mrf.mxu0  ;;  %v4315_v34 = vpop.f32.mrf.mxu1 }
 0x492   : > { %v2249_v56 = vadd.f32 %v2248_v33, %v2087_v46  ;;  %v2262_v50 = vadd.f32 %v4315_v34, %v2088_v39 }
 0x494   : > { %v2602_v3 = vrot.slane %v2249_v56, 1 }
 0x496   : > { %v2183_v35 = vpop.f32.mrf.mxu3  ;;  %v2222_v36 = vpop.f32.mrf.mxu2 }
 0x497   : > { %v2184_v47 = vadd.f32 %v2183_v35, %v2082_v40  ;;  %v2223_v52 = vadd.f32 %v2222_v36, %v2085_v44 }
 0x499   : > { %v2250_v37 = vpop.f32.mrf.mxu0  ;;  %v2263_v38 = vpop.f32.mrf.mxu1  ;;  %v2597_v57 = vrot.slane %v2184_v47, 6  ;;  %v2600_v63 = vrot.slane %v2223_v52, 3 }
 0x49a   : > { %v2094_v38 = vperm.slane %v1277_v22, 6 }
 0x49b   : > { %v2627_v4 = vsel %vm2626_vm13, %v2597_v57, %v2598_v61  ;;  %v2630_v9 = vsel %vm2629_vm14, %v2599_v1, %v2600_v63 }
 0x49c   : > { %v2628_v11 = vsel %vm667_vm0, %v2625_v8, %v2627_v4 }
 0x49e   : > { %v2185_v41 = vpop.f32.mrf.mxu3  ;;  %v2224_v60 = vpop.f32.mrf.mxu2 }
 0x4a1   : > { %v2300_v48 = vpop.f32.mrf.mxu0  ;;  %v2313_v49 = vpop.f32.mrf.mxu1 }
 0x4a2   : > { %v2301_v35 = vadd.f32 %v2300_v48, %v2091_v26  ;;  %v2314_v40 = vadd.f32 %v2313_v49, %v2092_v29 }
 0x4a4   : > { %v2605_v44 = vrot.slane %v2301_v35, 5  ;;  %v2606_v51 = vrot.slane %v2314_v40, 4 }
 0x4a6   : > { %v2235_v58 = vpop.f32.mrf.mxu3  ;;  %v2274_v59 = vpop.f32.mrf.mxu2 }
 0x4a7   : > { %v2236_v0 = vadd.f32 %v2235_v58, %v2086_v53  ;;  %v2275_v36 = vadd.f32 %v2274_v59, %v2089_v27 }
 0x4a9   : > { %v2601_v5 = vrot.slane %v2236_v0, 2  ;;  %v2302_v6 = vpop.f32.mrf.mxu0  ;;  %v2315_v7 = vpop.f32.mrf.mxu1  ;;  %v2603_v45 = vrot.slane %v2275_v36, 7 }
 0x4ab   : > { %v2632_v10 = vsel %vm2631_vm15, %v2601_v5, %v2602_v3  ;;  %v2636_v49 = vsel %vm2624_vm12, %v2262_v50, %v2603_v45  ;;  %v1278_v5 = vld [vmem:[%s4423_s16 + $0x10] sm:$0xff] }
 0x4ac   : > { %v2634_v12 = vsel %vm2633_vm1, %v2630_v9, %v2632_v10  ;;  %v2098_v6 = vperm.slane %v1278_v5, 2  ;;  %v2099_v9 = vperm.slane %v1278_v5, 3  ;;  %v2097_v10 = vperm.slane %v1278_v5, 1 }
 0x4ad   : > { %v2635_v13 = vsel %vm812_vm2, %v2628_v11, %v2634_v12  ;;  %v2101_v11 = vperm.slane %v1278_v5, 5  ;;  %v2100_v12 = vperm.slane %v1278_v5, 4  ;;  %v2096_v22 = vperm.slane %v1278_v5, 0 }
 0x4ae   : > { %2661 = vst [vmem:[%s4330_s19] sm:$0xff] %v2635_v13  ;;  %v2237_v14 = vpop.f32.mrf.mxu3  ;;  %v2276_v15 = vpop.f32.mrf.mxu2  ;;  %v2103_v13 = vperm.slane %v1278_v5, 7 }
 0x4b1   : > { %v2352_v16 = vpop.f32.mrf.mxu0  ;;  %v4333_v17 = vpop.f32.mrf.mxu1 }
 0x4b2   : > { %v2353_v41 = vadd.f32 %v2352_v16, %v2095_v30  ;;  %v2366_v35 = vadd.f32 %v4333_v17, %v2096_v22 }
 0x4b4   : > { %v2609_v52 = vrot.slane %v2353_v41, 1 }
 0x4b6   : > { %v2287_v18 = vpop.f32.mrf.mxu3  ;;  %v2326_v19 = vpop.f32.mrf.mxu2 }
 0x4b7   : > { %v2288_v31 = vadd.f32 %v2287_v18, %v2090_v23  ;;  %v2327_v37 = vadd.f32 %v2326_v19, %v2093_v28 }
 0x4b9   : > { %v2354_v20 = vpop.f32.mrf.mxu0  ;;  %v2367_v21 = vpop.f32.mrf.mxu1  ;;  %v2604_v60 = vrot.slane %v2288_v31, 6  ;;  %v2607_v46 = vrot.slane %v2327_v37, 3 }
 0x4ba   : > { %v2102_v21 = vperm.slane %v1278_v5, 6 }
 0x4bb   : > { %v2637_v48 = vsel %vm2626_vm13, %v2604_v60, %v2605_v44  ;;  %v2639_v56 = vsel %vm2629_vm14, %v2606_v51, %v2607_v46 }
 0x4bc   : > { %v2638_v58 = vsel %vm667_vm0, %v2636_v49, %v2637_v48 }
 0x4be   : > { %v2289_v24 = vpop.f32.mrf.mxu3  ;;  %v2328_v25 = vpop.f32.mrf.mxu2 }
 0x4c1   : > { %v2404_v32 = vpop.f32.mrf.mxu0  ;;  %v2417_v33 = vpop.f32.mrf.mxu1 }
 0x4c2   : > { %v2405_v18 = vadd.f32 %v2404_v32, %v2099_v9  ;;  %v2418_v23 = vadd.f32 %v2417_v33, %v2100_v12 }
 0x4c4   : > { %v2612_v28 = vrot.slane %v2405_v18, 5  ;;  %v2613_v36 = vrot.slane %v2418_v23, 4 }
 0x4c6   : > { %v2339_v42 = vpop.f32.mrf.mxu3  ;;  %v2378_v43 = vpop.f32.mrf.mxu2 }
 0x4c7   : > { %v2340_v47 = vadd.f32 %v2339_v42, %v2094_v38  ;;  %v2379_v19 = vadd.f32 %v2378_v43, %v2097_v10 }
 0x4c9   : > { %v2608_v53 = vrot.slane %v2340_v47, 2  ;;  %v2406_v54 = vpop.f32.mrf.mxu0  ;;  %v2419_v55 = vpop.f32.mrf.mxu1  ;;  %v2610_v29 = vrot.slane %v2379_v19, 7 }
 0x4cb   : > { %v2640_v57 = vsel %vm2631_vm15, %v2608_v53, %v2609_v52  ;;  %v2643_v33 = vsel %vm2624_vm12, %v2366_v35, %v2610_v29  ;;  %v1279_v52 = vld [vmem:[%s4423_s16 + $0x18] sm:$0xff] }
 0x4cc   : > { %v2641_v59 = vsel %vm2633_vm1, %v2639_v56, %v2640_v57  ;;  %v2106_v48 = vperm.slane %v1279_v52, 2  ;;  %v2107_v55 = vperm.slane %v1279_v52, 3  ;;  %v2105_v49 = vperm.slane %v1279_v52, 1 }
 0x4cd   : > { %v2642_v61 = vsel %vm812_vm2, %v2638_v58, %v2641_v59  ;;  %v2109_v56 = vperm.slane %v1279_v52, 5  ;;  %v2108_v57 = vperm.slane %v1279_v52, 4  ;;  %v2111_v58 = vperm.slane %v1279_v52, 7 }
 0x4ce   : > { %2662 = vst [vmem:[%s4330_s19 + $0x8] sm:$0xff] %v2642_v61  ;;  %v2341_v34 = vpop.f32.mrf.mxu3  ;;  %v2380_v62 = vpop.f32.mrf.mxu2 }
 0x4d1   : > { %v2456_v63 = vpop.f32.mrf.mxu0  ;;  %v4347_v0 = vpop.f32.mrf.mxu1 }
 0x4d2   : > { %v2457_v24 = vadd.f32 %v2456_v63, %v2103_v13  ;;  %v2110_v63 = vperm.slane %v1279_v52, 6 }
 0x4d4   : > { %v2616_v37 = vrot.slane %v2457_v24, 1 }
 0x4d6   : > { %v2391_v1 = vpop.f32.mrf.mxu3  ;;  %v2430_v2 = vpop.f32.mrf.mxu2 }
 0x4d7   : > { %v2392_v14 = vadd.f32 %v2391_v1, %v2098_v6  ;;  %v2431_v20 = vadd.f32 %v2430_v2, %v2101_v11  ;;  %v2104_v1 = vperm.slane %v1279_v52, 0 }
 0x4d9   : > { %v2458_v3 = vpop.f32.mrf.mxu0  ;;  %v2471_v4 = vpop.f32.mrf.mxu1  ;;  %v2611_v25 = vrot.slane %v2392_v14, 6  ;;  %v2614_v30 = vrot.slane %v2431_v20, 3  ;;  %v2470_v10 = vadd.f32 %v4347_v0, %v2104_v1 }
 0x4db   : > { %v2644_v32 = vsel %vm2626_vm13, %v2611_v25, %v2612_v28  ;;  %v2646_v41 = vsel %vm2629_vm14, %v2613_v36, %v2614_v30 }
 0x4dc   : > { %v2645_v42 = vsel %vm667_vm0, %v2643_v33, %v2644_v32 }
 0x4de   : > { %v2393_v7 = vpop.f32.mrf.mxu3  ;;  %v2432_v8 = vpop.f32.mrf.mxu2 }
 0x4e1   : > { %v2508_v15 = vpop.f32.mrf.mxu0  ;;  %v2521_v16 = vpop.f32.mrf.mxu1 }
 0x4e2   : > { %v2509_v61 = vadd.f32 %v2508_v15, %v2107_v55  ;;  %v2522_v2 = vadd.f32 %v2521_v16, %v2108_v57 }
 0x4e4   : > { %v2619_v6 = vrot.slane %v2509_v61, 5  ;;  %v2620_v11 = vrot.slane %v2522_v2, 4 }
 0x4e6   : > { %v2443_v26 = vpop.f32.mrf.mxu3  ;;  %v2482_v27 = vpop.f32.mrf.mxu2 }
 0x4e7   : > { %v2444_v31 = vadd.f32 %v2443_v26, %v2102_v21  ;;  %v2483_v34 = vadd.f32 %v2482_v27, %v2105_v49 }
 0x4e9   : > { %v2615_v38 = vrot.slane %v2444_v31, 2  ;;  %v2510_v39 = vpop.f32.mrf.mxu0  ;;  %v2523_v40 = vpop.f32.mrf.mxu1  ;;  %v2617_v7 = vrot.slane %v2483_v34, 7 }
 0x4eb   : > { %v2647_v60 = vsel %vm2631_vm15, %v2615_v38, %v2616_v37  ;;  %v2650_v15 = vsel %vm2624_vm12, %v2470_v10, %v2617_v7 }
 0x4ec   : > { %v2648_v43 = vsel %vm2633_vm1, %v2646_v41, %v2647_v60 }
 0x4ed   : > { %v2649_v44 = vsel %vm812_vm2, %v2645_v42, %v2648_v43 }
 0x4ee   : > { %2663 = vst [vmem:[%s4330_s19 + $0x10] sm:$0xff] %v2649_v44  ;;  %v2445_v17 = vpop.f32.mrf.mxu3  ;;  %v2484_v45 = vpop.f32.mrf.mxu2 }
 0x4f1   : > { %v2560_v46 = vpop.f32.mrf.mxu0 }
 0x4f2   : > { %v2561_v3 = vadd.f32 %v2560_v46, %v2111_v58 }
 0x4f4   : > { %v2623_v12 = vrot.slane %v2561_v3, 1 }
 0x4f6   : > { %v2495_v47 = vpop.f32.mrf.mxu3  ;;  %v2534_v50 = vpop.f32.mrf.mxu2 }
 0x4f7   : > { %v2496_v59 = vadd.f32 %v2495_v47, %v2106_v48  ;;  %v2535_v62 = vadd.f32 %v2534_v50, %v2109_v56 }
 0x4f9   : > { %v2562_v51 = vpop.f32.mrf.mxu0  ;;  %v2618_v4 = vrot.slane %v2496_v59, 6  ;;  %v2621_v8 = vrot.slane %v2535_v62, 3 }
 0x4fb   : > { %v2651_v13 = vsel %vm2626_vm13, %v2618_v4, %v2619_v6  ;;  %v2653_v16 = vsel %vm2629_vm14, %v2620_v11, %v2621_v8 }
 0x4fc   : > { %v2652_v19 = vsel %vm667_vm0, %v2650_v15, %v2651_v13 }
 0x4fe   : > { %v2497_v53 = vpop.f32.mrf.mxu3  ;;  %v2536_v54 = vpop.f32.mrf.mxu2 }
 0x506   : > { %v2547_v5 = vpop.f32.mrf.mxu3 }
 0x507   : > { %v2548_v9 = vadd.f32 %v2547_v5, %v2110_v63 }
 0x509   : > { %v2622_v14 = vrot.slane %v2548_v9, 2 }
 0x50b   : > { %v2654_v18 = vsel %vm2631_vm15, %v2622_v14, %v2623_v12 }
 0x50c   : > { %v2655_v20 = vsel %vm2633_vm1, %v2653_v16, %v2654_v18 }
 0x50d   : > { %v2656_v0 = vsel %vm812_vm2, %v2652_v19, %v2655_v20 }
 0x50e   : > { %2664 = vst [vmem:[%s4330_s19 + $0x18] sm:$0xff] %v2656_v0  ;;  %v2549_v21 = vpop.f32.mrf.mxu3 }
 0x50f   : > { %3852 = shalt.err (!%p3849_p8)
}
 0x510   : > { %3555 = dma.vmem_to_hbm [thread:$0]  (%p4047_p5), %s2679_s28, 512, %s2681_s1, %s2666_s25  }
 0x511 PF: > { %s4460_s26 = sld [smem:[#allocation23_spill]] }
 0x512   : > { %s4461_s24 = sld [smem:[#allocation20_spill]] }
 0x517   : > { %p3592_p9 = scmp.ge.s32.totalorder %s4460_s26, 2 }
 0x518   : > { %s2692_s18 = sand.u32 1, %s4461_s24  }
 0x519   : > { %p3577_p10 = pnand %p3592_p9, %p4051_p6  ;;  %s2693_s23 = scalar_lea.sflag [#allocation5], %s2692_s18 }
 0x51b   : > { %p3578_p11 = pneg %p3577_p10 }
 0x51d   : > { %3886 = dma.done.wait (%p3578_p11), %s2693_s23, 512  }
 0x51e   : > { %3888 = vsyncadd (%p3578_p11), %s2693_s23, 4294966784  ;;  %s4463_s27 = sld [smem:[#allocation24_spill]] }
 0x51f   : > { %s4464_s24 = sld [smem:[#allocation21_spill]] }
 0x520   : > { %s4465_s25 = sld [smem:[#allocation22_spill]] }
 0x521   : > { %s4466_s26 = sld [smem:[#allocation25_spill]] }
 0x524   : > { %p31_p12 = scmp.ge.s32.totalorder %s4463_s27, 4  }
 0x526   :  { %33 = sbr.rel (!%p31_p12) target bundleno = 13 (0xd), region = 158 }
 0x52b   :  { %2699 = vsyncpa [#allocation4], 1 }
 0x52c   :  { %2701 = vsyncpa [#allocation4 + $0x1], 1 }
 0x52d   :  { %2702 = vsyncpa [#allocation7], 1 }
 0x52e   :  { %2703 = vsyncpa [#allocation10], 1 }
 0x52f   :  { %2704 = vsyncpa [#allocation13], 1 }
 0x530   :  { %2705 = vsyncpa [#allocation5], 1 }
 0x531   :  { %2707 = vsyncpa [#allocation5 + $0x1], 1 }

</bundles_post_ra>
